<compile_context>
chip_gen: v6e
topology: v6e:2x2x1
jax: 0.10.0
libtpu: 0.0.40
codegen_flags: <defaults>
</compile_context>

<pallas_src>
import functools

import jax
import jax.numpy as jnp
import numpy as np
from jax import lax
from jax.experimental import pallas as pl
from jax.experimental.pallas import tpu as pltpu


# ------------------------------ fused Pallas kernel ------------------------------


def _fused_codebook_kernel(
    z_ref, qw_ref, qb_ref, cb_ref, cbt_ref, esq_ref, bd_ref, bb_ref,
    mega_ref, loss_ref, idx_ref,
    *, num_heads, beta, inv_codebook_num,
):
    # ---- stage 1: quant_act linear (MXU, f32 accumulate) ----
    z_lat = (
        jnp.dot(z_ref[...].astype(jnp.float32), qw_ref[...],
                preferred_element_type=jnp.float32)
        + qb_ref[...]
    )                                                               # (tm, L)

    tm = z_lat.shape[0]
    n_codes = cb_ref.shape[1]

    # hoisted out of the head loop (JAX does not CSE broadcast_in_dim)
    lane_iota = lax.broadcasted_iota(jnp.int32, (tm, n_codes), 1)   # (tm, N)

    residual = z_lat
    loss = jnp.zeros((tm, 1), jnp.float32)
    idx_parts = []

    # ---- stage 2: residual VQ (heads are sequentially dependent -> static unroll) ----
    for h in range(num_heads):
        # distance codebook is pre-transposed to (L, N) -> natural MXU contraction
        cross = lax.dot_general(
            residual, cbt_ref[h], (((1,), (0,)), ((), ())),
            preferred_element_type=jnp.float32,
        )                                                           # (tm, N)
        # ||r||^2 is argmin-invariant but kept so d matches the reference formula.
        r_sq = jnp.sum(residual * residual, axis=-1, keepdims=True)
        d = r_sq + esq_ref[h] - 2.0 * cross                         # (tm, N)

        # argmin with first-occurrence tie-break (torch.argmin semantics)
        min_d = jnp.min(d, axis=-1, keepdims=True)
        idx = jnp.min(
            jnp.where(d == min_d, lane_iota, n_codes), axis=-1, keepdims=True
        )
        # TODO(synk): an all-NaN row of d has no finite argmin; clamp keeps it in-range.
        idx = jnp.minimum(idx, n_codes - 1)                         # (tm, 1) int32

        # gather selected codebook rows via exact one-hot matmul (MXU friendly)
        onehot = (lane_iota == idx).astype(jnp.float32)             # (tm, N)
        zq = lax.dot_general(
            onehot, cb_ref[h], (((1,), (0,)), ((), ())),
            preferred_element_type=jnp.float32,
        )                                                           # (tm, L)

        diff = zq - residual
        loss = loss + jnp.mean(diff * diff, axis=-1, keepdims=True) * (1.0 + beta)
        residual = residual - zq
        idx_parts.append(idx)

    # ---- stage 3: lane-dense coalesced output via ONE MXU matmul ----
    # onehot_all row i has a single 1.0 at column h*N + idx_h[i] for each head h;
    # bd_aug = [blockdiag(cb) | vstack(cb) | vstack(cb) @ post_w]  (host precomputed)
    # so the product is [per-head z_q | z_q_out | post_quant(z_q_out) (bias added below)].
    big_iota = lax.broadcasted_iota(jnp.int32, (tm, num_heads * n_codes), 1)
    onehot_all = jnp.zeros((tm, num_heads * n_codes), jnp.float32)
    for h in range(num_heads):
        onehot_all = onehot_all + (
            big_iota == (idx_parts[h] + h * n_codes)
        ).astype(jnp.float32)
    mega_ref[...] = (
        lax.dot_general(onehot_all, bd_ref[...], (((1,), (0,)), ((), ())),
                        preferred_element_type=jnp.float32)
        + bb_ref[...]
    )

    # small outputs
    head_iota = lax.broadcasted_iota(jnp.int32, (tm, num_heads), 1)
    idx_all = jnp.zeros((tm, num_heads), jnp.int32)
    for h in range(num_heads):
        idx_all = jnp.where(head_iota == h, idx_parts[h], idx_all)
    idx_ref[...] = idx_all
    loss_ref[...] = loss * inv_codebook_num


def _round_up(x, m):
    return (x + m - 1) // m * m


def pallas_residual_codebook(
    z_flat, quant_w, quant_b, codebooks, post_w, post_b,
    *, beta, codebook_num, l2norm_h, tile_m=128,
):
    """Fused quant_act -> residual VQ -> post_quant, tiled over M = B*R."""
    M, C = z_flat.shape
    H, N, L = codebooks.shape
    out_dim = post_w.shape[1]
    hp = jax.lax.Precision.HIGHEST

    # ---- hoisted codebook preprocessing (once per call, not per tile/head) ----
    if l2norm_h:
        norms = jnp.sqrt(jnp.sum(codebooks * codebooks, axis=-1, keepdims=True))
        cb_d = codebooks / jnp.maximum(norms, 1e-12)    # F.normalize(p=2) semantics
    else:
        cb_d = codebooks
    cb_d_t = jnp.transpose(cb_d, (0, 2, 1))             # (H, L, N) natural contraction
    e_sq = jnp.sum(cb_d * cb_d, axis=-1)[:, None, :]    # (H, 1, N)

    # augmented gather matrix for the lane-dense mega output (loop-invariant)
    flat_cb = codebooks.reshape(H * N, L).astype(jnp.float32)
    blockdiag = jnp.zeros((H * N, H * L), jnp.float32)
    for h in range(H):
        blockdiag = blockdiag.at[h * N:(h + 1) * N, h * L:(h + 1) * L].set(codebooks[h])
    bd_aug = jnp.concatenate(
        [blockdiag, flat_cb, jnp.dot(flat_cb, post_w, precision=hp)], axis=1
    )                                                    # (H*N, H*L + L + out_dim)
    mega_w = H * L + L + out_dim
    bias_aug = jnp.concatenate(
        [jnp.zeros((H * L + L,), jnp.float32), post_b.astype(jnp.float32)]
    )[None, :]                                           # (1, mega_w)

    # ---- tiling: partial last block handled by Pallas masking (no host pad/slice) ----
    tm = min(tile_m, _round_up(M, 8))
    grid = (pl.cdiv(M, tm),)

    kernel = functools.partial(
        _fused_codebook_kernel,
        num_heads=H, beta=float(beta),
        inv_codebook_num=1.0 / float(codebook_num),
    )

    def resident(*shape):
        # constant index_map -> block stays resident in VMEM across grid steps
        return pl.BlockSpec(shape, lambda i, _n=len(shape): (0,) * _n)

    grid_spec = pltpu.PrefetchScalarGridSpec(
        num_scalar_prefetch=0,
        grid=grid,
        in_specs=[
            pl.BlockSpec((tm, C), lambda i: (i, 0)),     # z tile (pipelined)
            resident(C, L), resident(1, L),              # quant_act W, b
            resident(H, N, L),                           # raw codebooks (gather)
            resident(H, L, N),                           # pre-transposed dist codebooks
            resident(H, 1, N),                           # ||cb_d||^2
            resident(H * N, mega_w),                     # augmented gather matrix
            resident(1, mega_w),                         # augmented bias
        ],
        out_specs=(
            pl.BlockSpec((tm, mega_w), lambda i: (i, 0)),   # lane-dense mega slab
            pl.BlockSpec((tm, 1), lambda i: (i, 0)),        # loss per token
            pl.BlockSpec((tm, H), lambda i: (i, 0)),        # indices
        ),
    )
    out_shapes = (
        jax.ShapeDtypeStruct((M, mega_w), jnp.float32),
        jax.ShapeDtypeStruct((M, 1), jnp.float32),
        jax.ShapeDtypeStruct((M, H), jnp.int32),
    )

    mega, loss, idx = pl.pallas_call(
        kernel,
        grid_spec=grid_spec,
        out_shape=out_shapes,
        compiler_params=pltpu.CompilerParams(
            dimension_semantics=("parallel",),      # megacore sharding on v7x
            vmem_limit_bytes=32 * 1024 * 1024,
        ),
    )(z_flat.astype(jnp.float32), quant_w, quant_b.reshape(1, -1),
      codebooks, cb_d_t, e_sq, bd_aug, bias_aug)

    zq_each = mega[:, : H * L]                 # (M, H*L) lane-dense per-head z_q
    zq_out = mega[:, H * L: H * L + L]         # (M, L)   summed z_q
    zq_final = mega[:, H * L + L:]             # (M, out) post_quant output
    return zq_final, zq_out, zq_each, idx, loss[:, 0]


# ------------------------------ module wrapper ------------------------------


class Args:
    num_codebook_vectors = 64
    latent_dim = 32
    l2norm_h = False
    beta = 0.25
    only_codebook_num = None
    codebook_dropout_from = 1


def init_params(key, args, input_dim, out_dim, codebook_num):
    k1, k2, k3, k4, k5 = jax.random.split(key, 5)
    latent = args.latent_dim

    def linear_init(kw, kb, fan_in, fan_out):
        bound = 1.0 / np.sqrt(fan_in)
        w = jax.random.uniform(kw, (fan_in, fan_out), jnp.float32, -bound, bound)
        b = jax.random.uniform(kb, (fan_out,), jnp.float32, -bound, bound)
        return w, b

    quant_w, quant_b = linear_init(k1, k2, input_dim, latent)
    post_w, post_b = linear_init(k3, k4, latent, out_dim)
    cb_bound = 1.0 / args.num_codebook_vectors
    codebooks = jax.random.uniform(
        k5, (codebook_num, args.num_codebook_vectors, latent),
        jnp.float32, -cb_bound, cb_bound,
    )
    return dict(
        quant_w=quant_w, quant_b=quant_b,
        post_w=post_w, post_b=post_b,
        codebooks=codebooks,
    )


def residual_codebook_forward(
    params, args, z, *, codebook_num, return_all_indices=False,
    use_codebook_num=4, tile_m=128,
):
    """Forward pass of ResidualCodebook (eval mode: no codebook dropout)."""
    # TODO(synk): training-time codebook_dropout uses np.random host randomness;
    #             only the deterministic eval path is implemented here.
    B, R, C = z.shape
    dtype = z.dtype
    L = args.latent_dim
    out_dim = params["post_w"].shape[1]

    curr = min(use_codebook_num, codebook_num)
    cbs = params["codebooks"][:curr]

    z_flat = z.reshape(B * R, C)
    zq_final, zq_out, zq_each, idx, loss = pallas_residual_codebook(
        z_flat, params["quant_w"], params["quant_b"], cbs,
        params["post_w"], params["post_b"],
        beta=args.beta, codebook_num=codebook_num, l2norm_h=args.l2norm_h,
        tile_m=tile_m,
    )

    z_q = zq_final.reshape(B, R, out_dim).astype(dtype)
    loss = loss.reshape(B, R).astype(dtype)
    # lane-dense (M, H*L) slab -> (B, H, R, L) to match torch.cat(z_q_list, 1)
    z_q_list = jnp.transpose(zq_each.reshape(B, R, curr, L), (0, 2, 1, 3))
    indices = [idx[:, h] for h in range(curr)]
    z_q_out = zq_out.reshape(B, R, L)
    loss_dict = {}

    if return_all_indices:
        return z_q, indices, loss, loss_dict, z_q_list, z_q_out
    return z_q, [indices[0]], loss, loss_dict, z_q_list, z_q_out


# ------------------------------ plain-JAX reference ------------------------------


def reference_forward(params, args, z, *, codebook_num, use_codebook_num=4):
    hp = jax.lax.Precision.HIGHEST
    B, R, C = z.shape
    z_lat = (jnp.dot(z.reshape(B * R, C).astype(jnp.float32), params["quant_w"],
                     precision=hp) + params["quant_b"])
    residual = z_lat
    z_q_out = jnp.zeros_like(z_lat)
    loss = jnp.zeros((B * R,), jnp.float32)
    idx_list, zq_list = [], []
    curr = min(use_codebook_num, codebook_num)
    for h in range(curr):
        cb = params["codebooks"][h]
        cb_d = cb
        if args.l2norm_h:
            cb_d = cb_d / jnp.maximum(
                jnp.linalg.norm(cb_d, axis=-1, keepdims=True), 1e-12)
        d = (jnp.sum(residual ** 2, 1, keepdims=True)
             + jnp.sum(cb_d ** 2, 1)
             - 2.0 * jnp.dot(residual, cb_d.T, precision=hp))
        idx = jnp.argmin(d, axis=1)
        zq = cb[idx]
        loss = loss + jnp.mean((zq - residual) ** 2, -1) * (1.0 + args.beta)
        z_q_out = z_q_out + zq
        residual = residual - zq
        idx_list.append(idx)
        zq_list.append(zq.reshape(B, R, -1))
    loss = loss / codebook_num
    z_q = jnp.dot(z_q_out, params["post_w"], precision=hp) + params["post_b"]
    zq_stack = jnp.stack(zq_list, axis=1)   # (B, H, R, L)
    return (z_q.reshape(B, R, -1), idx_list, loss.reshape(B, R),
            z_q_out.reshape(B, R, -1), zq_stack)


# ------------------------------ main ------------------------------


if __name__ == "__main__":
    args = Args()
    B, R = 2, 8
    input_dim = 16
    codebook_num = 4

    key = jax.random.PRNGKey(0)
    kp, kz, kz2 = jax.random.split(key, 3)
    params = init_params(kp, args, input_dim, input_dim, codebook_num)
    z = jax.random.normal(kz, (B, R, input_dim), jnp.float32)

    z_q, indices, loss, loss_dict, z_q_list, z_q_out = residual_codebook_forward(
        params, args, z, codebook_num=codebook_num,
        return_all_indices=True, use_codebook_num=4,
    )
    jax.block_until_ready((z_q, loss, z_q_list, z_q_out))

    # sanity-check against a plain-JAX reference (f32-precision matmuls)
    ref_zq, ref_idx, ref_loss, ref_zqout, ref_zqlist = reference_forward(
        params, args, z, codebook_num=codebook_num, use_codebook_num=4)
    np.testing.assert_allclose(np.asarray(z_q), np.asarray(ref_zq),
                               rtol=5e-4, atol=5e-4)
    np.testing.assert_allclose(np.asarray(loss), np.asarray(ref_loss),
                               rtol=5e-4, atol=5e-4)
    np.testing.assert_allclose(np.asarray(z_q_out), np.asarray(ref_zqout),
                               rtol=5e-4, atol=5e-4)
    np.testing.assert_allclose(np.asarray(z_q_list), np.asarray(ref_zqlist),
                               rtol=5e-4, atol=5e-4)
    for a, b in zip(indices, ref_idx):
        assert np.array_equal(np.asarray(a), np.asarray(b)), "index mismatch"

    # l2norm_h=True path (normalized distance codebooks, raw gather)
    args_l2 = Args()
    args_l2.l2norm_h = True
    zq_l2, _, loss_l2, _, _, _ = residual_codebook_forward(
        params, args_l2, z, codebook_num=codebook_num,
        return_all_indices=True, use_codebook_num=4,
    )
    rl2 = reference_forward(params, args_l2, z, codebook_num=codebook_num,
                            use_codebook_num=4)
    np.testing.assert_allclose(np.asarray(zq_l2), np.asarray(rl2[0]),
                               rtol=5e-4, atol=5e-4)
    np.testing.assert_allclose(np.asarray(loss_l2), np.asarray(rl2[2]),
                               rtol=5e-4, atol=5e-4)

    # exercise the multi-tile / partial-last-block path (grid > 1, no host pad)
    B2, R2 = 3, 500                      # M = 1500 -> grid = 12 at tm = 128
    z_big = jax.random.normal(kz2, (B2, R2, input_dim), jnp.float32)
    zq_b, idx_b, loss_b, _, zqlist_b, zqout_b = residual_codebook_forward(
        params, args, z_big, codebook_num=codebook_num,
        return_all_indices=True, use_codebook_num=4, tile_m=128,
    )
    jax.block_until_ready((zq_b, loss_b, zqlist_b, zqout_b))
    assert zq_b.shape == (B2, R2, input_dim)
    assert loss_b.shape == (B2, R2)
    assert zqlist_b.shape == (B2, codebook_num, R2, args.latent_dim)
    assert zqout_b.shape == (B2, R2, args.latent_dim)
    assert bool(jnp.isfinite(zq_b).all()) and bool(jnp.isfinite(loss_b).all())

    # value check vs reference, tolerant to FP near-tie argmin flips (MXU vs XLA paths)
    rb = reference_forward(params, args, z_big, codebook_num=codebook_num,
                           use_codebook_num=4)
    idx_k = np.stack([np.asarray(i) for i in idx_b], axis=1)
    idx_r = np.stack([np.asarray(i) for i in rb[1]], axis=1)
    row_ok = (idx_k == idx_r).all(axis=1)
    assert row_ok.mean() > 0.99, f"index agreement too low: {row_ok.mean()}"
    zq_k_flat = np.asarray(zq_b).reshape(-1, input_dim)
    zq_r_flat = np.asarray(rb[0]).reshape(-1, input_dim)
    np.testing.assert_allclose(zq_k_flat[row_ok], zq_r_flat[row_ok],
                               rtol=5e-4, atol=5e-4)
    loss_k_flat = np.asarray(loss_b).reshape(-1)
    loss_r_flat = np.asarray(rb[2]).reshape(-1)
    np.testing.assert_allclose(loss_k_flat[row_ok], loss_r_flat[row_ok],
                               rtol=5e-4, atol=5e-4)

    print("KERNEL_OK")
</pallas_src>

<mosaic_0001>
module attributes {stable_mosaic.version = 11 : i64} {
  func.func @_fused_codebook_kernel(%arg0: i32, %arg1: memref<16x16xf32, #tpu.memory_space<vmem>>, %arg2: memref<16x32xf32, #tpu.memory_space<vmem>>, %arg3: memref<1x32xf32, #tpu.memory_space<vmem>>, %arg4: memref<4x64x32xf32, #tpu.memory_space<vmem>>, %arg5: memref<4x32x64xf32, #tpu.memory_space<vmem>>, %arg6: memref<4x1x64xf32, #tpu.memory_space<vmem>>, %arg7: memref<256x176xf32, #tpu.memory_space<vmem>>, %arg8: memref<1x176xf32, #tpu.memory_space<vmem>>, %arg9: memref<16x176xf32, #tpu.memory_space<vmem>>, %arg10: memref<16x1xf32, #tpu.memory_space<vmem>>, %arg11: memref<16x4xi32, #tpu.memory_space<vmem>>) attributes {dimension_semantics = [#tpu.dimension_semantics<parallel>], iteration_bounds = array<i64: 1>, scalar_prefetch = 0 : i64, scratch_operands = 0 : i64, tpu.core_type = #tpu.core_type<tc>, window_params = [{transform_indices = @transform_0, window_bounds = array<i64: 16, 16>}, {pipeline_mode = #tpu.pipeline_mode<synchronous>, transform_indices = @transform_1, window_bounds = array<i64: 16, 32>}, {pipeline_mode = #tpu.pipeline_mode<synchronous>, transform_indices = @transform_2, window_bounds = array<i64: 1, 32>}, {pipeline_mode = #tpu.pipeline_mode<synchronous>, transform_indices = @transform_3, window_bounds = array<i64: 4, 64, 32>}, {pipeline_mode = #tpu.pipeline_mode<synchronous>, transform_indices = @transform_4, window_bounds = array<i64: 4, 32, 64>}, {pipeline_mode = #tpu.pipeline_mode<synchronous>, transform_indices = @transform_5, window_bounds = array<i64: 4, 1, 64>}, {pipeline_mode = #tpu.pipeline_mode<synchronous>, transform_indices = @transform_6, window_bounds = array<i64: 256, 176>}, {pipeline_mode = #tpu.pipeline_mode<synchronous>, transform_indices = @transform_7, window_bounds = array<i64: 1, 176>}, {transform_indices = @transform_8, window_bounds = array<i64: 16, 176>}, {transform_indices = @transform_9, window_bounds = array<i64: 16, 1>}, {transform_indices = @transform_10, window_bounds = array<i64: 16, 4>}]} {
    %c0 = arith.constant 0 : index
    %c0_0 = arith.constant 0 : index
    %0 = vector.load %arg1[%c0, %c0_0] : memref<16x16xf32, #tpu.memory_space<vmem>>, vector<16x16xf32>
    %c0_1 = arith.constant 0 : index
    %c0_2 = arith.constant 0 : index
    %1 = vector.load %arg2[%c0_1, %c0_2] : memref<16x32xf32, #tpu.memory_space<vmem>>, vector<16x32xf32>
    %cst = arith.constant dense<0.000000e+00> : vector<16x32xf32>
    %2 = tpu.matmul %0, %1, %cst {dimension_numbers = #tpu.dot_dimension_numbers<[1], [0], [0], [1], [0, 0, 1, 1], [], []>} : vector<16x16xf32>, vector<16x32xf32>, vector<16x32xf32> -> vector<16x32xf32>
    %c0_3 = arith.constant 0 : index
    %c0_4 = arith.constant 0 : index
    %3 = vector.load %arg3[%c0_3, %c0_4] : memref<1x32xf32, #tpu.memory_space<vmem>>, vector<1x32xf32>
    %4 = vector.broadcast %3 : vector<1x32xf32> to vector<16x32xf32>
    %5 = arith.addf %2, %4 : vector<16x32xf32>
    %6 = tpu.iota {dimensions = array<i32: 1>} : vector<16x64xi32>
    %cst_5 = arith.constant 0.000000e+00 : f32
    %7 = vector.broadcast %cst_5 : f32 to vector<16x1xf32>
    %c0_6 = arith.constant 0 : index
    %c0_7 = arith.constant 0 : index
    %c0_8 = arith.constant 0 : index
    %8 = vector.load %arg5[%c0_6, %c0_7, %c0_8] : memref<4x32x64xf32, #tpu.memory_space<vmem>>, vector<1x32x64xf32>
    %9 = vector.shape_cast %8 : vector<1x32x64xf32> to vector<32x64xf32>
    %cst_9 = arith.constant dense<0.000000e+00> : vector<16x64xf32>
    %10 = tpu.matmul %5, %9, %cst_9 {dimension_numbers = #tpu.dot_dimension_numbers<[1], [0], [0], [1], [0, 0, 1, 1], [], []>} : vector<16x32xf32>, vector<32x64xf32>, vector<16x64xf32> -> vector<16x64xf32>
    %11 = arith.mulf %5, %5 : vector<16x32xf32>
    %cst_10 = arith.constant dense<0.000000e+00> : vector<16xf32>
    %12 = vector.multi_reduction <add>, %11, %cst_10 [1] : vector<16x32xf32> to vector<16xf32>
    %13 = vector.shape_cast %12 : vector<16xf32> to vector<16x1xf32>
    %c0_11 = arith.constant 0 : index
    %c0_12 = arith.constant 0 : index
    %c0_13 = arith.constant 0 : index
    %14 = vector.load %arg6[%c0_11, %c0_12, %c0_13] : memref<4x1x64xf32, #tpu.memory_space<vmem>>, vector<1x1x64xf32>
    %15 = vector.shape_cast %14 : vector<1x1x64xf32> to vector<1x64xf32>
    %16 = vector.broadcast %13 : vector<16x1xf32> to vector<16x64xf32>
    %17 = vector.broadcast %15 : vector<1x64xf32> to vector<16x64xf32>
    %18 = arith.addf %16, %17 : vector<16x64xf32>
    %cst_14 = arith.constant 2.000000e+00 : f32
    %19 = vector.broadcast %cst_14 : f32 to vector<16x64xf32>
    %20 = arith.mulf %19, %10 : vector<16x64xf32>
    %21 = arith.subf %18, %20 : vector<16x64xf32>
    %cst_15 = arith.constant dense<0x7F800000> : vector<16xf32>
    %22 = vector.multi_reduction <minimumf>, %21, %cst_15 [1] : vector<16x64xf32> to vector<16xf32>
    %23 = vector.shape_cast %22 : vector<16xf32> to vector<16x1xf32>
    %24 = vector.broadcast %23 : vector<16x1xf32> to vector<16x64xf32>
    %25 = arith.cmpf oeq, %21, %24 : vector<16x64xf32>
    %c64_i32 = arith.constant 64 : i32
    %26 = vector.broadcast %c64_i32 : i32 to vector<16x64xi32>
    %27 = arith.select %25, %6, %26 : vector<16x64xi1>, vector<16x64xi32>
    %cst_16 = arith.constant dense<2147483647> : vector<16xi32>
    %28 = vector.multi_reduction <minsi>, %27, %cst_16 [1] : vector<16x64xi32> to vector<16xi32>
    %29 = vector.shape_cast %28 : vector<16xi32> to vector<16x1xi32>
    %c63_i32 = arith.constant 63 : i32
    %30 = vector.broadcast %c63_i32 : i32 to vector<16x1xi32>
    %31 = arith.minsi %29, %30 : vector<16x1xi32>
    %32 = vector.broadcast %31 : vector<16x1xi32> to vector<16x64xi32>
    %33 = arith.cmpi eq, %6, %32 : vector<16x64xi32>
    %34 = arith.extui %33 : vector<16x64xi1> to vector<16x64xi32>
    %35 = arith.sitofp %34 : vector<16x64xi32> to vector<16x64xf32>
    %c0_17 = arith.constant 0 : index
    %c0_18 = arith.constant 0 : index
    %c0_19 = arith.constant 0 : index
    %36 = vector.load %arg4[%c0_17, %c0_18, %c0_19] : memref<4x64x32xf32, #tpu.memory_space<vmem>>, vector<1x64x32xf32>
    %37 = vector.shape_cast %36 : vector<1x64x32xf32> to vector<64x32xf32>
    %cst_20 = arith.constant dense<0.000000e+00> : vector<16x32xf32>
    %38 = tpu.matmul %35, %37, %cst_20 {dimension_numbers = #tpu.dot_dimension_numbers<[1], [0], [0], [1], [0, 0, 1, 1], [], []>} : vector<16x64xf32>, vector<64x32xf32>, vector<16x32xf32> -> vector<16x32xf32>
    %39 = arith.subf %38, %5 : vector<16x32xf32>
    %40 = arith.mulf %39, %39 : vector<16x32xf32>
    %cst_21 = arith.constant dense<0.000000e+00> : vector<16xf32>
    %41 = vector.multi_reduction <add>, %40, %cst_21 [1] : vector<16x32xf32> to vector<16xf32>
    %42 = vector.shape_cast %41 : vector<16xf32> to vector<16x1xf32>
    %cst_22 = arith.constant 3.200000e+01 : f32
    %43 = vector.broadcast %cst_22 : f32 to vector<16x1xf32>
    %44 = arith.divf %42, %43 : vector<16x1xf32>
    %cst_23 = arith.constant 1.250000e+00 : f32
    %45 = vector.broadcast %cst_23 : f32 to vector<16x1xf32>
    %46 = arith.mulf %44, %45 : vector<16x1xf32>
    %47 = arith.addf %7, %46 : vector<16x1xf32>
    %48 = arith.subf %5, %38 : vector<16x32xf32>
    %c1 = arith.constant 1 : index
    %c0_24 = arith.constant 0 : index
    %c0_25 = arith.constant 0 : index
    %49 = vector.load %arg5[%c1, %c0_24, %c0_25] : memref<4x32x64xf32, #tpu.memory_space<vmem>>, vector<1x32x64xf32>
    %50 = vector.shape_cast %49 : vector<1x32x64xf32> to vector<32x64xf32>
    %cst_26 = arith.constant dense<0.000000e+00> : vector<16x64xf32>
    %51 = tpu.matmul %48, %50, %cst_26 {dimension_numbers = #tpu.dot_dimension_numbers<[1], [0], [0], [1], [0, 0, 1, 1], [], []>} : vector<16x32xf32>, vector<32x64xf32>, vector<16x64xf32> -> vector<16x64xf32>
    %52 = arith.mulf %48, %48 : vector<16x32xf32>
    %cst_27 = arith.constant dense<0.000000e+00> : vector<16xf32>
    %53 = vector.multi_reduction <add>, %52, %cst_27 [1] : vector<16x32xf32> to vector<16xf32>
    %54 = vector.shape_cast %53 : vector<16xf32> to vector<16x1xf32>
    %c1_28 = arith.constant 1 : index
    %c0_29 = arith.constant 0 : index
    %c0_30 = arith.constant 0 : index
    %55 = vector.load %arg6[%c1_28, %c0_29, %c0_30] : memref<4x1x64xf32, #tpu.memory_space<vmem>>, vector<1x1x64xf32>
    %56 = vector.shape_cast %55 : vector<1x1x64xf32> to vector<1x64xf32>
    %57 = vector.broadcast %54 : vector<16x1xf32> to vector<16x64xf32>
    %58 = vector.broadcast %56 : vector<1x64xf32> to vector<16x64xf32>
    %59 = arith.addf %57, %58 : vector<16x64xf32>
    %cst_31 = arith.constant 2.000000e+00 : f32
    %60 = vector.broadcast %cst_31 : f32 to vector<16x64xf32>
    %61 = arith.mulf %60, %51 : vector<16x64xf32>
    %62 = arith.subf %59, %61 : vector<16x64xf32>
    %cst_32 = arith.constant dense<0x7F800000> : vector<16xf32>
    %63 = vector.multi_reduction <minimumf>, %62, %cst_32 [1] : vector<16x64xf32> to vector<16xf32>
    %64 = vector.shape_cast %63 : vector<16xf32> to vector<16x1xf32>
    %65 = vector.broadcast %64 : vector<16x1xf32> to vector<16x64xf32>
    %66 = arith.cmpf oeq, %62, %65 : vector<16x64xf32>
    %c64_i32_33 = arith.constant 64 : i32
    %67 = vector.broadcast %c64_i32_33 : i32 to vector<16x64xi32>
    %68 = arith.select %66, %6, %67 : vector<16x64xi1>, vector<16x64xi32>
    %cst_34 = arith.constant dense<2147483647> : vector<16xi32>
    %69 = vector.multi_reduction <minsi>, %68, %cst_34 [1] : vector<16x64xi32> to vector<16xi32>
    %70 = vector.shape_cast %69 : vector<16xi32> to vector<16x1xi32>
    %c63_i32_35 = arith.constant 63 : i32
    %71 = vector.broadcast %c63_i32_35 : i32 to vector<16x1xi32>
    %72 = arith.minsi %70, %71 : vector<16x1xi32>
    %73 = vector.broadcast %72 : vector<16x1xi32> to vector<16x64xi32>
    %74 = arith.cmpi eq, %6, %73 : vector<16x64xi32>
    %75 = arith.extui %74 : vector<16x64xi1> to vector<16x64xi32>
    %76 = arith.sitofp %75 : vector<16x64xi32> to vector<16x64xf32>
    %c1_36 = arith.constant 1 : index
    %c0_37 = arith.constant 0 : index
    %c0_38 = arith.constant 0 : index
    %77 = vector.load %arg4[%c1_36, %c0_37, %c0_38] : memref<4x64x32xf32, #tpu.memory_space<vmem>>, vector<1x64x32xf32>
    %78 = vector.shape_cast %77 : vector<1x64x32xf32> to vector<64x32xf32>
    %cst_39 = arith.constant dense<0.000000e+00> : vector<16x32xf32>
    %79 = tpu.matmul %76, %78, %cst_39 {dimension_numbers = #tpu.dot_dimension_numbers<[1], [0], [0], [1], [0, 0, 1, 1], [], []>} : vector<16x64xf32>, vector<64x32xf32>, vector<16x32xf32> -> vector<16x32xf32>
    %80 = arith.subf %79, %48 : vector<16x32xf32>
    %81 = arith.mulf %80, %80 : vector<16x32xf32>
    %cst_40 = arith.constant dense<0.000000e+00> : vector<16xf32>
    %82 = vector.multi_reduction <add>, %81, %cst_40 [1] : vector<16x32xf32> to vector<16xf32>
    %83 = vector.shape_cast %82 : vector<16xf32> to vector<16x1xf32>
    %cst_41 = arith.constant 3.200000e+01 : f32
    %84 = vector.broadcast %cst_41 : f32 to vector<16x1xf32>
    %85 = arith.divf %83, %84 : vector<16x1xf32>
    %cst_42 = arith.constant 1.250000e+00 : f32
    %86 = vector.broadcast %cst_42 : f32 to vector<16x1xf32>
    %87 = arith.mulf %85, %86 : vector<16x1xf32>
    %88 = arith.addf %47, %87 : vector<16x1xf32>
    %89 = arith.subf %48, %79 : vector<16x32xf32>
    %c2 = arith.constant 2 : index
    %c0_43 = arith.constant 0 : index
    %c0_44 = arith.constant 0 : index
    %90 = vector.load %arg5[%c2, %c0_43, %c0_44] : memref<4x32x64xf32, #tpu.memory_space<vmem>>, vector<1x32x64xf32>
    %91 = vector.shape_cast %90 : vector<1x32x64xf32> to vector<32x64xf32>
    %cst_45 = arith.constant dense<0.000000e+00> : vector<16x64xf32>
    %92 = tpu.matmul %89, %91, %cst_45 {dimension_numbers = #tpu.dot_dimension_numbers<[1], [0], [0], [1], [0, 0, 1, 1], [], []>} : vector<16x32xf32>, vector<32x64xf32>, vector<16x64xf32> -> vector<16x64xf32>
    %93 = arith.mulf %89, %89 : vector<16x32xf32>
    %cst_46 = arith.constant dense<0.000000e+00> : vector<16xf32>
    %94 = vector.multi_reduction <add>, %93, %cst_46 [1] : vector<16x32xf32> to vector<16xf32>
    %95 = vector.shape_cast %94 : vector<16xf32> to vector<16x1xf32>
    %c2_47 = arith.constant 2 : index
    %c0_48 = arith.constant 0 : index
    %c0_49 = arith.constant 0 : index
    %96 = vector.load %arg6[%c2_47, %c0_48, %c0_49] : memref<4x1x64xf32, #tpu.memory_space<vmem>>, vector<1x1x64xf32>
    %97 = vector.shape_cast %96 : vector<1x1x64xf32> to vector<1x64xf32>
    %98 = vector.broadcast %95 : vector<16x1xf32> to vector<16x64xf32>
    %99 = vector.broadcast %97 : vector<1x64xf32> to vector<16x64xf32>
    %100 = arith.addf %98, %99 : vector<16x64xf32>
    %cst_50 = arith.constant 2.000000e+00 : f32
    %101 = vector.broadcast %cst_50 : f32 to vector<16x64xf32>
    %102 = arith.mulf %101, %92 : vector<16x64xf32>
    %103 = arith.subf %100, %102 : vector<16x64xf32>
    %cst_51 = arith.constant dense<0x7F800000> : vector<16xf32>
    %104 = vector.multi_reduction <minimumf>, %103, %cst_51 [1] : vector<16x64xf32> to vector<16xf32>
    %105 = vector.shape_cast %104 : vector<16xf32> to vector<16x1xf32>
    %106 = vector.broadcast %105 : vector<16x1xf32> to vector<16x64xf32>
    %107 = arith.cmpf oeq, %103, %106 : vector<16x64xf32>
    %c64_i32_52 = arith.constant 64 : i32
    %108 = vector.broadcast %c64_i32_52 : i32 to vector<16x64xi32>
    %109 = arith.select %107, %6, %108 : vector<16x64xi1>, vector<16x64xi32>
    %cst_53 = arith.constant dense<2147483647> : vector<16xi32>
    %110 = vector.multi_reduction <minsi>, %109, %cst_53 [1] : vector<16x64xi32> to vector<16xi32>
    %111 = vector.shape_cast %110 : vector<16xi32> to vector<16x1xi32>
    %c63_i32_54 = arith.constant 63 : i32
    %112 = vector.broadcast %c63_i32_54 : i32 to vector<16x1xi32>
    %113 = arith.minsi %111, %112 : vector<16x1xi32>
    %114 = vector.broadcast %113 : vector<16x1xi32> to vector<16x64xi32>
    %115 = arith.cmpi eq, %6, %114 : vector<16x64xi32>
    %116 = arith.extui %115 : vector<16x64xi1> to vector<16x64xi32>
    %117 = arith.sitofp %116 : vector<16x64xi32> to vector<16x64xf32>
    %c2_55 = arith.constant 2 : index
    %c0_56 = arith.constant 0 : index
    %c0_57 = arith.constant 0 : index
    %118 = vector.load %arg4[%c2_55, %c0_56, %c0_57] : memref<4x64x32xf32, #tpu.memory_space<vmem>>, vector<1x64x32xf32>
    %119 = vector.shape_cast %118 : vector<1x64x32xf32> to vector<64x32xf32>
    %cst_58 = arith.constant dense<0.000000e+00> : vector<16x32xf32>
    %120 = tpu.matmul %117, %119, %cst_58 {dimension_numbers = #tpu.dot_dimension_numbers<[1], [0], [0], [1], [0, 0, 1, 1], [], []>} : vector<16x64xf32>, vector<64x32xf32>, vector<16x32xf32> -> vector<16x32xf32>
    %121 = arith.subf %120, %89 : vector<16x32xf32>
    %122 = arith.mulf %121, %121 : vector<16x32xf32>
    %cst_59 = arith.constant dense<0.000000e+00> : vector<16xf32>
    %123 = vector.multi_reduction <add>, %122, %cst_59 [1] : vector<16x32xf32> to vector<16xf32>
    %124 = vector.shape_cast %123 : vector<16xf32> to vector<16x1xf32>
    %cst_60 = arith.constant 3.200000e+01 : f32
    %125 = vector.broadcast %cst_60 : f32 to vector<16x1xf32>
    %126 = arith.divf %124, %125 : vector<16x1xf32>
    %cst_61 = arith.constant 1.250000e+00 : f32
    %127 = vector.broadcast %cst_61 : f32 to vector<16x1xf32>
    %128 = arith.mulf %126, %127 : vector<16x1xf32>
    %129 = arith.addf %88, %128 : vector<16x1xf32>
    %130 = arith.subf %89, %120 : vector<16x32xf32>
    %c3 = arith.constant 3 : index
    %c0_62 = arith.constant 0 : index
    %c0_63 = arith.constant 0 : index
    %131 = vector.load %arg5[%c3, %c0_62, %c0_63] : memref<4x32x64xf32, #tpu.memory_space<vmem>>, vector<1x32x64xf32>
    %132 = vector.shape_cast %131 : vector<1x32x64xf32> to vector<32x64xf32>
    %cst_64 = arith.constant dense<0.000000e+00> : vector<16x64xf32>
    %133 = tpu.matmul %130, %132, %cst_64 {dimension_numbers = #tpu.dot_dimension_numbers<[1], [0], [0], [1], [0, 0, 1, 1], [], []>} : vector<16x32xf32>, vector<32x64xf32>, vector<16x64xf32> -> vector<16x64xf32>
    %134 = arith.mulf %130, %130 : vector<16x32xf32>
    %cst_65 = arith.constant dense<0.000000e+00> : vector<16xf32>
    %135 = vector.multi_reduction <add>, %134, %cst_65 [1] : vector<16x32xf32> to vector<16xf32>
    %136 = vector.shape_cast %135 : vector<16xf32> to vector<16x1xf32>
    %c3_66 = arith.constant 3 : index
    %c0_67 = arith.constant 0 : index
    %c0_68 = arith.constant 0 : index
    %137 = vector.load %arg6[%c3_66, %c0_67, %c0_68] : memref<4x1x64xf32, #tpu.memory_space<vmem>>, vector<1x1x64xf32>
    %138 = vector.shape_cast %137 : vector<1x1x64xf32> to vector<1x64xf32>
    %139 = vector.broadcast %136 : vector<16x1xf32> to vector<16x64xf32>
    %140 = vector.broadcast %138 : vector<1x64xf32> to vector<16x64xf32>
    %141 = arith.addf %139, %140 : vector<16x64xf32>
    %cst_69 = arith.constant 2.000000e+00 : f32
    %142 = vector.broadcast %cst_69 : f32 to vector<16x64xf32>
    %143 = arith.mulf %142, %133 : vector<16x64xf32>
    %144 = arith.subf %141, %143 : vector<16x64xf32>
    %cst_70 = arith.constant dense<0x7F800000> : vector<16xf32>
    %145 = vector.multi_reduction <minimumf>, %144, %cst_70 [1] : vector<16x64xf32> to vector<16xf32>
    %146 = vector.shape_cast %145 : vector<16xf32> to vector<16x1xf32>
    %147 = vector.broadcast %146 : vector<16x1xf32> to vector<16x64xf32>
    %148 = arith.cmpf oeq, %144, %147 : vector<16x64xf32>
    %c64_i32_71 = arith.constant 64 : i32
    %149 = vector.broadcast %c64_i32_71 : i32 to vector<16x64xi32>
    %150 = arith.select %148, %6, %149 : vector<16x64xi1>, vector<16x64xi32>
    %cst_72 = arith.constant dense<2147483647> : vector<16xi32>
    %151 = vector.multi_reduction <minsi>, %150, %cst_72 [1] : vector<16x64xi32> to vector<16xi32>
    %152 = vector.shape_cast %151 : vector<16xi32> to vector<16x1xi32>
    %c63_i32_73 = arith.constant 63 : i32
    %153 = vector.broadcast %c63_i32_73 : i32 to vector<16x1xi32>
    %154 = arith.minsi %152, %153 : vector<16x1xi32>
    %155 = vector.broadcast %154 : vector<16x1xi32> to vector<16x64xi32>
    %156 = arith.cmpi eq, %6, %155 : vector<16x64xi32>
    %157 = arith.extui %156 : vector<16x64xi1> to vector<16x64xi32>
    %158 = arith.sitofp %157 : vector<16x64xi32> to vector<16x64xf32>
    %c3_74 = arith.constant 3 : index
    %c0_75 = arith.constant 0 : index
    %c0_76 = arith.constant 0 : index
    %159 = vector.load %arg4[%c3_74, %c0_75, %c0_76] : memref<4x64x32xf32, #tpu.memory_space<vmem>>, vector<1x64x32xf32>
    %160 = vector.shape_cast %159 : vector<1x64x32xf32> to vector<64x32xf32>
    %cst_77 = arith.constant dense<0.000000e+00> : vector<16x32xf32>
    %161 = tpu.matmul %158, %160, %cst_77 {dimension_numbers = #tpu.dot_dimension_numbers<[1], [0], [0], [1], [0, 0, 1, 1], [], []>} : vector<16x64xf32>, vector<64x32xf32>, vector<16x32xf32> -> vector<16x32xf32>
    %162 = arith.subf %161, %130 : vector<16x32xf32>
    %163 = arith.mulf %162, %162 : vector<16x32xf32>
    %cst_78 = arith.constant dense<0.000000e+00> : vector<16xf32>
    %164 = vector.multi_reduction <add>, %163, %cst_78 [1] : vector<16x32xf32> to vector<16xf32>
    %165 = vector.shape_cast %164 : vector<16xf32> to vector<16x1xf32>
    %cst_79 = arith.constant 3.200000e+01 : f32
    %166 = vector.broadcast %cst_79 : f32 to vector<16x1xf32>
    %167 = arith.divf %165, %166 : vector<16x1xf32>
    %cst_80 = arith.constant 1.250000e+00 : f32
    %168 = vector.broadcast %cst_80 : f32 to vector<16x1xf32>
    %169 = arith.mulf %167, %168 : vector<16x1xf32>
    %170 = arith.addf %129, %169 : vector<16x1xf32>
    %171 = tpu.iota {dimensions = array<i32: 1>} : vector<16x256xi32>
    %cst_81 = arith.constant 0.000000e+00 : f32
    %172 = vector.broadcast %cst_81 : f32 to vector<16x256xf32>
    %c0_i32 = arith.constant 0 : i32
    %173 = vector.broadcast %c0_i32 : i32 to vector<16x1xi32>
    %174 = arith.addi %31, %173 : vector<16x1xi32>
    %175 = vector.broadcast %174 : vector<16x1xi32> to vector<16x256xi32>
    %176 = arith.cmpi eq, %171, %175 : vector<16x256xi32>
    %177 = arith.extui %176 : vector<16x256xi1> to vector<16x256xi32>
    %178 = arith.sitofp %177 : vector<16x256xi32> to vector<16x256xf32>
    %179 = arith.addf %172, %178 : vector<16x256xf32>
    %c64_i32_82 = arith.constant 64 : i32
    %180 = vector.broadcast %c64_i32_82 : i32 to vector<16x1xi32>
    %181 = arith.addi %72, %180 : vector<16x1xi32>
    %182 = vector.broadcast %181 : vector<16x1xi32> to vector<16x256xi32>
    %183 = arith.cmpi eq, %171, %182 : vector<16x256xi32>
    %184 = arith.extui %183 : vector<16x256xi1> to vector<16x256xi32>
    %185 = arith.sitofp %184 : vector<16x256xi32> to vector<16x256xf32>
    %186 = arith.addf %179, %185 : vector<16x256xf32>
    %c128_i32 = arith.constant 128 : i32
    %187 = vector.broadcast %c128_i32 : i32 to vector<16x1xi32>
    %188 = arith.addi %113, %187 : vector<16x1xi32>
    %189 = vector.broadcast %188 : vector<16x1xi32> to vector<16x256xi32>
    %190 = arith.cmpi eq, %171, %189 : vector<16x256xi32>
    %191 = arith.extui %190 : vector<16x256xi1> to vector<16x256xi32>
    %192 = arith.sitofp %191 : vector<16x256xi32> to vector<16x256xf32>
    %193 = arith.addf %186, %192 : vector<16x256xf32>
    %c192_i32 = arith.constant 192 : i32
    %194 = vector.broadcast %c192_i32 : i32 to vector<16x1xi32>
    %195 = arith.addi %154, %194 : vector<16x1xi32>
    %196 = vector.broadcast %195 : vector<16x1xi32> to vector<16x256xi32>
    %197 = arith.cmpi eq, %171, %196 : vector<16x256xi32>
    %198 = arith.extui %197 : vector<16x256xi1> to vector<16x256xi32>
    %199 = arith.sitofp %198 : vector<16x256xi32> to vector<16x256xf32>
    %200 = arith.addf %193, %199 : vector<16x256xf32>
    %c0_83 = arith.constant 0 : index
    %c0_84 = arith.constant 0 : index
    %201 = vector.load %arg7[%c0_83, %c0_84] : memref<256x176xf32, #tpu.memory_space<vmem>>, vector<256x176xf32>
    %cst_85 = arith.constant dense<0.000000e+00> : vector<16x176xf32>
    %202 = tpu.matmul %200, %201, %cst_85 {dimension_numbers = #tpu.dot_dimension_numbers<[1], [0], [0], [1], [0, 0, 1, 1], [], []>} : vector<16x256xf32>, vector<256x176xf32>, vector<16x176xf32> -> vector<16x176xf32>
    %c0_86 = arith.constant 0 : index
    %c0_87 = arith.constant 0 : index
    %203 = vector.load %arg8[%c0_86, %c0_87] : memref<1x176xf32, #tpu.memory_space<vmem>>, vector<1x176xf32>
    %204 = vector.broadcast %203 : vector<1x176xf32> to vector<16x176xf32>
    %205 = arith.addf %202, %204 : vector<16x176xf32>
    %c0_88 = arith.constant 0 : index
    %c0_89 = arith.constant 0 : index
    %206 = vector.load %arg9[%c0_88, %c0_89] : memref<16x176xf32, #tpu.memory_space<vmem>>, vector<16x176xf32>
    tpu.vector_store %arg9[%c0_88, %c0_89], %205 {strides = array<i32>} : memref<16x176xf32, #tpu.memory_space<vmem>>, vector<16x176xf32>,
    %207 = tpu.iota {dimensions = array<i32: 1>} : vector<16x4xi32>
    %c0_i32_90 = arith.constant 0 : i32
    %208 = vector.broadcast %c0_i32_90 : i32 to vector<16x4xi32>
    %c0_i32_91 = arith.constant 0 : i32
    %209 = vector.broadcast %c0_i32_91 : i32 to vector<16x4xi32>
    %210 = arith.cmpi eq, %207, %209 : vector<16x4xi32>
    %211 = vector.shape_cast %31 : vector<16x1xi32> to vector<16x1xi32>
    %212 = vector.broadcast %211 : vector<16x1xi32> to vector<16x4xi32>
    %213 = arith.select %210, %212, %208 : vector<16x4xi1>, vector<16x4xi32>
    %c1_i32 = arith.constant 1 : i32
    %214 = vector.broadcast %c1_i32 : i32 to vector<16x4xi32>
    %215 = arith.cmpi eq, %207, %214 : vector<16x4xi32>
    %216 = vector.shape_cast %72 : vector<16x1xi32> to vector<16x1xi32>
    %217 = vector.broadcast %216 : vector<16x1xi32> to vector<16x4xi32>
    %218 = arith.select %215, %217, %213 : vector<16x4xi1>, vector<16x4xi32>
    %c2_i32 = arith.constant 2 : i32
    %219 = vector.broadcast %c2_i32 : i32 to vector<16x4xi32>
    %220 = arith.cmpi eq, %207, %219 : vector<16x4xi32>
    %221 = vector.shape_cast %113 : vector<16x1xi32> to vector<16x1xi32>
    %222 = vector.broadcast %221 : vector<16x1xi32> to vector<16x4xi32>
    %223 = arith.select %220, %222, %218 : vector<16x4xi1>, vector<16x4xi32>
    %c3_i32 = arith.constant 3 : i32
    %224 = vector.broadcast %c3_i32 : i32 to vector<16x4xi32>
    %225 = arith.cmpi eq, %207, %224 : vector<16x4xi32>
    %226 = vector.shape_cast %154 : vector<16x1xi32> to vector<16x1xi32>
    %227 = vector.broadcast %226 : vector<16x1xi32> to vector<16x4xi32>
    %228 = arith.select %225, %227, %223 : vector<16x4xi1>, vector<16x4xi32>
    %c0_92 = arith.constant 0 : index
    %c0_93 = arith.constant 0 : index
    %229 = vector.load %arg11[%c0_92, %c0_93] : memref<16x4xi32, #tpu.memory_space<vmem>>, vector<16x4xi32>
    tpu.vector_store %arg11[%c0_92, %c0_93], %228 {strides = array<i32>} : memref<16x4xi32, #tpu.memory_space<vmem>>, vector<16x4xi32>,
    %cst_94 = arith.constant 2.500000e-01 : f32
    %230 = vector.broadcast %cst_94 : f32 to vector<16x1xf32>
    %231 = arith.mulf %170, %230 : vector<16x1xf32>
    %c0_95 = arith.constant 0 : index
    %c0_96 = arith.constant 0 : index
    %232 = vector.load %arg10[%c0_95, %c0_96] : memref<16x1xf32, #tpu.memory_space<vmem>>, vector<16x1xf32>
    tpu.vector_store %arg10[%c0_95, %c0_96], %231 {strides = array<i32>} : memref<16x1xf32, #tpu.memory_space<vmem>>, vector<16x1xf32>,
    return
  }
  func.func @transform_0(%arg0: i32) -> (i32, i32) {
    %c0_i32 = arith.constant 0 : i32
    %c0_i32_0 = arith.constant 0 : i32
    return %arg0, %c0_i32 : i32, i32
  }
  func.func @transform_1(%arg0: i32) -> (i32, i32) {
    %c0_i32 = arith.constant 0 : i32
    %c0_i32_0 = arith.constant 0 : i32
    %c0_i32_1 = arith.constant 0 : i32
    return %c0_i32, %c0_i32_0 : i32, i32
  }
  func.func @transform_2(%arg0: i32) -> (i32, i32) {
    %c0_i32 = arith.constant 0 : i32
    %c0_i32_0 = arith.constant 0 : i32
    %c0_i32_1 = arith.constant 0 : i32
    return %c0_i32, %c0_i32_0 : i32, i32
  }
  func.func @transform_3(%arg0: i32) -> (i32, i32, i32) {
    %c0_i32 = arith.constant 0 : i32
    %c0_i32_0 = arith.constant 0 : i32
    %c0_i32_1 = arith.constant 0 : i32
    %c0_i32_2 = arith.constant 0 : i32
    return %c0_i32, %c0_i32_0, %c0_i32_1 : i32, i32, i32
  }
  func.func @transform_4(%arg0: i32) -> (i32, i32, i32) {
    %c0_i32 = arith.constant 0 : i32
    %c0_i32_0 = arith.constant 0 : i32
    %c0_i32_1 = arith.constant 0 : i32
    %c0_i32_2 = arith.constant 0 : i32
    return %c0_i32, %c0_i32_0, %c0_i32_1 : i32, i32, i32
  }
  func.func @transform_5(%arg0: i32) -> (i32, i32, i32) {
    %c0_i32 = arith.constant 0 : i32
    %c0_i32_0 = arith.constant 0 : i32
    %c0_i32_1 = arith.constant 0 : i32
    %c0_i32_2 = arith.constant 0 : i32
    return %c0_i32, %c0_i32_0, %c0_i32_1 : i32, i32, i32
  }
  func.func @transform_6(%arg0: i32) -> (i32, i32) {
    %c0_i32 = arith.constant 0 : i32
    %c0_i32_0 = arith.constant 0 : i32
    %c0_i32_1 = arith.constant 0 : i32
    return %c0_i32, %c0_i32_0 : i32, i32
  }
  func.func @transform_7(%arg0: i32) -> (i32, i32) {
    %c0_i32 = arith.constant 0 : i32
    %c0_i32_0 = arith.constant 0 : i32
    %c0_i32_1 = arith.constant 0 : i32
    return %c0_i32, %c0_i32_0 : i32, i32
  }
  func.func @transform_8(%arg0: i32) -> (i32, i32) {
    %c0_i32 = arith.constant 0 : i32
    %c0_i32_0 = arith.constant 0 : i32
    return %arg0, %c0_i32 : i32, i32
  }
  func.func @transform_9(%arg0: i32) -> (i32, i32) {
    %c0_i32 = arith.constant 0 : i32
    %c0_i32_0 = arith.constant 0 : i32
    return %arg0, %c0_i32 : i32, i32
  }
  func.func @transform_10(%arg0: i32) -> (i32, i32) {
    %c0_i32 = arith.constant 0 : i32
    %c0_i32_0 = arith.constant 0 : i32
    return %arg0, %c0_i32 : i32, i32
  }
}

</mosaic_0001>

<bundles_post_ra>
// kernel: tpu_custom_call.1
= control target key start
LH: loop header
LB: loop body
LE: loop exit
PB: predicated region body
PF: predicated region fallthrough
CT: control target
= control target key end

     0   :  { %vm44_vm0 = vcmask 130048   ;;  %s2471_s0 = inlined_call_operand.vmem [shape: f32[16,16], index: 0, kind: input, shape index: {}]   ;;  %s2472_s1 = inlined_call_operand.vmem [shape: f32[16,32], index: 1, kind: input, shape index: {}]   ;;  %s2473_s2 = inlined_call_operand.vmem [shape: f32[1,32], index: 2, kind: input, shape index: {}]   ;;  %s2474_s3 = inlined_call_operand.vmem [shape: f32[4,64,32], index: 3, kind: input, shape index: {}]   ;;  %s2475_s4 = inlined_call_operand.vmem [shape: f32[4,32,64], index: 4, kind: input, shape index: {}]   ;;  %s2476_s5 = inlined_call_operand.vmem [shape: f32[4,1,64], index: 5, kind: input, shape index: {}]   ;;  %s2477_s6 = inlined_call_operand.vmem [shape: f32[256,176], index: 6, kind: input, shape index: {}]   ;;  %s2478_s7 = inlined_call_operand.vmem [shape: f32[1,176], index: 7, kind: input, shape index: {}]   ;;  %s2479_s8 = inlined_call_operand.hbm [shape: f32[16,176], index: 8, kind: output, shape index: {0}]   ;;  %s2480_s9 = inlined_call_operand.vmem [shape: f32[16,1], index: 9, kind: output, shape index: {1}]   ;;  %s2481_s10 = inlined_call_operand.vmem [shape: s32[16,4], index: 10, kind: output, shape index: {2}]  }
   0x1   :  { %v36_v0 = vld [vmem:[%s2472_s1 + $0x8] sm:$0xff]  ;;  %v35_v1 = vld [vmem:[%s2472_s1] sm:$0xff] }
   0x2   :  { %v33_v2 = vld [vmem:[%s2471_s0] sm:$0xff]  ;;  %1609 = vmatprep.subr.mxu1 %v36_v0 }
   0x3   :  { %1613 = vmatprep.mubr.msk.f32.mxu1 %vm44_vm0, %v33_v2 }
   0x4   :  { %16 = vsyncpa [#allocation3], 0  ;;  %1610 = vmatpush3.msra.mxu1 %v36_v0  ;;  %v34_v3 = vld [vmem:[%s2471_s0 + $0x8] sm:$0xff]  ;;  %v131_v4 = vld [vmem:[%s2475_s4 + $0x18] sm:$0xff]  ;;  %vm132_vm1 = vcmask 261120   ;;  %vm235_vm2 = vcmask 523264   ;;  %v126_v30 = vlaneseq }
   0x5   :  { %1611 = vmatprep.subr.mxu1 %v35_v1  ;;  %v130_v5 = vld [vmem:[%s2475_s4 + $0x10] sm:$0xff]  ;;  %v129_v6 = vld [vmem:[%s2475_s4 + $0x8] sm:$0xff]  ;;  %v128_v7 = vld [vmem:[%s2475_s4] sm:$0xff] }
   0x6   :  { %1612 = vmatpush3.msra.mxu1 %v35_v1  ;;  %v1457_v9 = vld [vmem:[%s2473_s2] ss:$0 sm:$0xff]  ;;  %v1868_v31 = vand.u32 127, %v126_v30  ;;  %v293_v42 = vld [vmem:[%s2474_s3 + $0x38] sm:$0xff]  ;;  %v292_v43 = vld [vmem:[%s2474_s3 + $0x30] sm:$0xff] }
   0x7   :  { %1614 = vmatmul.mubr.msk.f32.vlgmr.msra.gmra.mxu1 %vm44_vm0, %v34_v3  ;;  %1616 = vmatprep.subr.mxu1 %v131_v4  ;;  %v1462_v18 = vld [vmem:[%s2476_s5] ss:$0 sm:$0xff]  ;;  %v291_v52 = vld [vmem:[%s2474_s3 + $0x28] sm:$0xff]  ;;  %v289_v54 = vld [vmem:[%s2474_s3 + $0x18] sm:$0xff] }
   0x8   :  { %1617 = vmatpush3.msra.mxu1 %v131_v4  ;;  %v290_v53 = vld [vmem:[%s2474_s3 + $0x20] sm:$0xff]  ;;  %v288_v55 = vld [vmem:[%s2474_s3 + $0x10] sm:$0xff]  ;;  %v287_v56 = vld [vmem:[%s2474_s3 + $0x8] sm:$0xff]  ;;  %vm1416_vm15 = vcmp.eq.s32.totalorder %v1868_v31, 1  ;;  %vm1413_vm0 = vcmp.eq.s32.totalorder %v1868_v31, 0 }
   0x9   :  { %1618 = vmatprep.subr.mxu1 %v130_v5  ;;  %v286_v57 = vld [vmem:[%s2474_s3] sm:$0xff]  ;;  %v1470_v58 = vld [vmem:[%s2475_s4 + $0x38] sm:$0xff] }
   0xa   :  { %1619 = vmatpush3.msra.mxu1 %v130_v5 }
   0xb   :  { %1620 = vmatprep.subr.mxu1 %v129_v6 }
   0xc   :  { %1621 = vmatpush3.msra.mxu1 %v129_v6  ;;  %v1762_v6 = vmov 0.0  }
   0xd   :  { %1622 = vmatprep.subr.mxu1 %v128_v7 }
   0xe   :  { %1623 = vmatpush3.msra.mxu1 %v128_v7 }
   0xf   :  { %1627 = vmatprep.subr.mxu1 %v293_v42 }
  0xc7   :  { %v1615_v8 = vpop.f32.mrf.mxu1 }
  0xc8   :  { %v1848_v11 = vadd.f32 %v1615_v8, %v1457_v9 }
  0xc9   :  { %v117_v10 = vpop.f32.mrf.mxu1 }
  0xca   :  { %v1850_v12 = vadd.f32 %v1457_v9, %v117_v10  ;;  %v215_v15 = vmul.f32 %v1848_v11, %v1848_v11  ;;  %v1469_v10 = vld [vmem:[%s2475_s4 + $0x30] sm:$0xff] }
  0xcc   :  { %1624 = vmatprep.mubr.msk.f32.mxu1 %vm132_vm1, %v1850_v12  ;;  %v214_v13 = vmul.f32 %v1850_v12, %v1850_v12  ;;  %v219_v16 = vsel %vm132_vm1, %v215_v15, 0.0 }
  0xcd   :  { %1625 = vmatmul.mubr.msk.f32.vlgmr.msra.gmra.mxu1 %vm132_vm1, %v1848_v11 }
  0xce   :  { %v216_v14 = vsel %vm132_vm1, %v214_v13, 0.0  ;;  %1628 = vmatpush3.msra.mxu1 %v293_v42  ;;  %v1468_v13 = vld [vmem:[%s2475_s4 + $0x28] sm:$0xff] }
  0xcf   :  { %217 = vadd.xlane.f32.xlu0 %v216_v14  ;;  %1629 = vmatprep.subr.mxu1 %v292_v43  ;;  %v1467_v14 = vld [vmem:[%s2475_s4 + $0x20] sm:$0xff] }
  0xd0   :  { %1630 = vmatpush3.msra.mxu1 %v292_v43 }
  0xd1   :  { %1631 = vmatprep.subr.mxu1 %v291_v52 }
  0xd2   :  { %1632 = vmatpush3.msra.mxu1 %v291_v52 }
  0xd3   :  { %220 = vadd.xlane.f32.xlu0 %v219_v16  ;;  %1633 = vmatprep.subr.mxu1 %v290_v53 }
  0xd4   :  { %1634 = vmatpush3.msra.mxu1 %v290_v53 }
  0xd5   :  { %1635 = vmatprep.subr.mxu1 %v289_v54 }
  0xd6   :  { %1636 = vmatpush3.msra.mxu1 %v289_v54 }
  0xd7   :  { %1637 = vmatprep.subr.mxu1 %v288_v55 }
  0xd8   :  { %1638 = vmatpush3.msra.mxu1 %v288_v55 }
  0xd9   :  { %1639 = vmatprep.subr.mxu1 %v287_v56 }
  0xda   :  { %1640 = vmatpush3.msra.mxu1 %v287_v56 }
  0xdb   :  { %1641 = vmatprep.subr.mxu1 %v286_v57 }
  0xdc   :  { %1642 = vmatpush3.msra.mxu1 %v286_v57 }
  0xdd   :  { %1646 = vmatprep.subr.mxu1 %v1470_v58 }
 0x158   :  { %v218_v17 = vpop.xlane.xlu0 %217 }
 0x159   :  { %v229_v22 = vadd.f32 %v1462_v18, %v218_v17 }
 0x15c   :  { %v221_v20 = vpop.xlane.xlu0 %220 }
 0x15d   :  { %v230_v25 = vadd.f32 %v1462_v18, %v221_v20 }
 0x18d   :  { %v1626_v19 = vpop.f32.mrf.mxu1 }
 0x18e   :  { %v232_v23 = vmul.f32 2.0, %v1626_v19 }
 0x18f   :  { %v205_v21 = vpop.f32.mrf.mxu1 }
 0x190   :  { %v231_v24 = vmul.f32 2.0, %v205_v21  ;;  %v234_v28 = vsub.f32 %v230_v25, %v232_v23  ;;  %v1474_v23 = vld [vmem:[%s2476_s5 + $0x1] ss:$0 sm:$0xff] }
 0x192   :  { %v233_v26 = vsub.f32 %v229_v22, %v231_v24  ;;  %v239_v29 = vsel %vm235_vm2, %v234_v28, inf }
 0x194   :  { %v236_v27 = vsel %vm235_vm2, %v233_v26, inf }
 0x195   :  { %237 = vmin.xlane.f32.xlu1 %v236_v27 }
 0x199   :  { %240 = vmin.xlane.f32.xlu1 %v239_v29 }
 0x21e   :  { %v238_v32 = vpop.xlane.xlu1 %237 }
 0x21f   :  { %vm242_vm3 = vcmp.eq.f32.partialorder %v233_v26, %v238_v32 }
 0x220   :  { %v244_v33 = vsel %vm242_vm3, %v1868_v31, 64 }
 0x221   :  { %v246_v34 = vsel %vm235_vm2, %v244_v33, 2147483647 }
 0x222   :  { %v241_v35 = vpop.xlane.xlu1 %240  ;;  %v248_v36 = vshra.s32 %v246_v34, 16  ;;  %v247_v44 = vand.u32 65535, %v246_v34 }
 0x223   :  { %vm243_vm4 = vcmp.eq.f32.partialorder %v234_v28, %v241_v35 }
 0x224   :  { %v245_v37 = vsel %vm243_vm4, %v1868_v31, 64  ;;  %v250_v38 = vcvt.s32.f32 %v248_v36  ;;  %v249_v46 = vcvt.s32.f32 %v247_v44 }
 0x225   :  { %v261_v39 = vsel %vm235_vm2, %v245_v37, 2147483647 }
 0x226   :  { %251 = vmin.xlane.f32.xlu0 %v250_v38  ;;  %v263_v40 = vshra.s32 %v261_v39, 16  ;;  %v262_v47 = vand.u32 65535, %v261_v39 }
 0x228   :  { %v265_v41 = vcvt.s32.f32 %v263_v40  ;;  %v264_v50 = vcvt.s32.f32 %v262_v47 }
 0x22a   :  { %266 = vmin.xlane.f32.xlu1 %v265_v41 }
 0x2af   :  { %v252_v45 = vpop.xlane.xlu0 %251 }
 0x2b0   :  { %vm253_vm5 = vcmp.eq.f32.partialorder %v250_v38, %v252_v45  ;;  %v258_v59 = vcvt.f32.s32 %v252_v45 }
 0x2b1   :  { %v254_v48 = vsel %vm253_vm5, %v249_v46, inf }
 0x2b2   :  { %255 = vmin.xlane.f32.xlu0 %v254_v48  ;;  %v259_v61 = vshll.u32 %v258_v59, 16  ;;  %v1484_v48 = vld [vmem:[%s2474_s3 + $0x78] sm:$0xff]  ;;  %v1481_v59 = vld [vmem:[%s2474_s3 + $0x60] sm:$0xff] }
 0x2b3   :  { %v267_v49 = vpop.xlane.xlu1 %266 }
 0x2b4   :  { %vm268_vm6 = vcmp.eq.f32.partialorder %v265_v41, %v267_v49  ;;  %v273_v62 = vcvt.f32.s32 %v267_v49  ;;  %v1483_v49 = vld [vmem:[%s2474_s3 + $0x70] sm:$0xff] }
 0x2b5   :  { %v269_v51 = vsel %vm268_vm6, %v264_v50, inf  ;;  %v1482_v50 = vld [vmem:[%s2474_s3 + $0x68] sm:$0xff] }
 0x2b6   :  { %270 = vmin.xlane.f32.xlu1 %v269_v51  ;;  %v274_v2 = vshll.u32 %v273_v62, 16  ;;  %v1478_v62 = vld [vmem:[%s2474_s3 + $0x48] sm:$0xff] }
 0x33b   :  { %v256_v60 = vpop.xlane.xlu0 %255 }
 0x33c   :  { %v257_v63 = vcvt.f32.s32 %v256_v60  ;;  %v1480_v60 = vld [vmem:[%s2474_s3 + $0x58] sm:$0xff] }
 0x33e   :  { %v260_v0 = vadd.s32 %v259_v61, %v257_v63  ;;  %v1479_v61 = vld [vmem:[%s2474_s3 + $0x50] sm:$0xff]  ;;  %v1477_v63 = vld [vmem:[%s2474_s3 + $0x40] sm:$0xff] }
 0x33f   :  { %v271_v1 = vpop.xlane.xlu1 %270 }
 0x340   :  { %vm276_vm7 = vcmp.lt.s32.totalorder %v260_v0, 63  ;;  %v272_v3 = vcvt.f32.s32 %v271_v1 }
 0x341   :  { %v1901_v4 = vsel %vm276_vm7, %v260_v0, 63  ;;  %v1490_v0 = vld [vmem:[%s2475_s4 + $0x58] sm:$0xff] }
 0x342   :  { %v275_v5 = vadd.s32 %v274_v2, %v272_v3  ;;  %vm280_vm8 = vcmp.eq.s32.totalorder %v1868_v31, %v1901_v4 }
 0x343   :  { %v1906_v7 = vsel %vm280_vm8, 1.0, %v1762_v6 }
 0x344   :  { %vm278_vm9 = vcmp.lt.s32.totalorder %v275_v5, 63  ;;  %1643 = vmatprep.mubr.msk.f32.mxu1 %vm235_vm2, %v1906_v7 }
 0x345   :  { %v1910_v8 = vsel %vm278_vm9, %v275_v5, 63 }
 0x346   :  { %vm281_vm10 = vcmp.eq.s32.totalorder %v1868_v31, %v1910_v8 }
 0x347   :  { %v1915_v9 = vsel %vm281_vm10, 1.0, %v1762_v6 }
 0x348   :  { %1644 = vmatmul.mubr.msk.f32.vlgmr.msra.gmra.mxu1 %vm235_vm2, %v1915_v9 }
 0x349   :  { %1647 = vmatpush3.msra.mxu1 %v1470_v58 }
 0x34a   :  { %1648 = vmatprep.subr.mxu1 %v1469_v10 }
 0x34b   :  { %1649 = vmatpush3.msra.mxu1 %v1469_v10 }
 0x34c   :  { %1650 = vmatprep.subr.mxu1 %v1468_v13 }
 0x34d   :  { %1651 = vmatpush3.msra.mxu1 %v1468_v13 }
 0x34e   :  { %1652 = vmatprep.subr.mxu1 %v1467_v14 }
 0x34f   :  { %1653 = vmatpush3.msra.mxu1 %v1467_v14 }
 0x350   :  { %1657 = vmatprep.subr.mxu1 %v1484_v48 }
 0x408   :  { %v1928_v15 = vpop.f32.mrf.mxu1 }
 0x409   :  { %v1932_v16 = vsub.f32 %v1848_v11, %v1928_v15 }
 0x40a   :  { %v1934_v17 = vpop.f32.mrf.mxu1 }
 0x40b   :  { %v1938_v18 = vsub.f32 %v1850_v12, %v1934_v17  ;;  %v481_v19 = vmul.f32 %v1932_v16, %v1932_v16 }
 0x40d   :  { %1654 = vmatprep.mubr.msk.f32.mxu1 %vm132_vm1, %v1938_v18  ;;  %v485_v20 = vsel %vm132_vm1, %v481_v19, 0.0  ;;  %v480_v21 = vmul.f32 %v1938_v18, %v1938_v18 }
 0x40e   :  { %486 = vadd.xlane.f32.xlu1 %v485_v20  ;;  %1655 = vmatmul.mubr.msk.f32.vlgmr.msra.gmra.mxu1 %vm132_vm1, %v1932_v16 }
 0x40f   :  { %v482_v22 = vsel %vm132_vm1, %v480_v21, 0.0  ;;  %1658 = vmatpush3.msra.mxu1 %v1484_v48  ;;  %v1987_v21 = vadd.s32 128, %v1868_v31 }
 0x410   :  { %483 = vadd.xlane.f32.xlu0 %v482_v22  ;;  %1659 = vmatprep.subr.mxu1 %v1483_v49 }
 0x411   :  { %1660 = vmatpush3.msra.mxu1 %v1483_v49  ;;  %vm1192_vm4 = vcmp.eq.s32.totalorder %v1987_v21, %v1910_v8  ;;  %vm1191_vm6 = vcmp.eq.s32.totalorder %v1987_v21, %v1901_v4 }
 0x412   :  { %1661 = vmatprep.subr.mxu1 %v1482_v50 }
 0x413   :  { %1662 = vmatpush3.msra.mxu1 %v1482_v50  ;;  %v1494_v50 = vld [vmem:[%s2476_s5 + $0x2] ss:$0 sm:$0xff] }
 0x414   :  { %1663 = vmatprep.subr.mxu1 %v1481_v59 }
 0x415   :  { %1664 = vmatpush3.msra.mxu1 %v1481_v59 }
 0x416   :  { %1665 = vmatprep.subr.mxu1 %v1480_v60 }
 0x417   :  { %1666 = vmatpush3.msra.mxu1 %v1480_v60 }
 0x418   :  { %1667 = vmatprep.subr.mxu1 %v1479_v61 }
 0x419   :  { %1668 = vmatpush3.msra.mxu1 %v1479_v61 }
 0x41a   :  { %1669 = vmatprep.subr.mxu1 %v1478_v62 }
 0x41b   :  { %1670 = vmatpush3.msra.mxu1 %v1478_v62 }
 0x41c   :  { %1671 = vmatprep.subr.mxu1 %v1477_v63 }
 0x41d   :  { %1672 = vmatpush3.msra.mxu1 %v1477_v63 }
 0x41e   :  { %1676 = vmatprep.subr.mxu1 %v1490_v0 }
 0x497   :  { %v487_v24 = vpop.xlane.xlu1 %486 }
 0x498   :  { %v497_v27 = vadd.f32 %v1474_v23, %v487_v24 }
 0x499   :  { %v484_v25 = vpop.xlane.xlu0 %483 }
 0x49a   :  { %v496_v32 = vadd.f32 %v1474_v23, %v484_v25  ;;  %v1415_v23 = vsel %vm1413_vm0, %v1910_v8, 0  ;;  %v1528_v8 = vsel %vm1192_vm4, 1.0, %v1762_v6 }
 0x4ce   :  { %v1656_v26 = vpop.f32.mrf.mxu1 }
 0x4cf   :  { %v499_v28 = vmul.f32 2.0, %v1656_v26 }
 0x4d0   :  { %v471_v29 = vpop.f32.mrf.mxu1 }
 0x4d1   :  { %v498_v33 = vmul.f32 2.0, %v471_v29  ;;  %v501_v34 = vsub.f32 %v497_v27, %v499_v28  ;;  %v1414_v27 = vsel %vm1413_vm0, %v1901_v4, 0 }
 0x4d3   :  { %v505_v35 = vsel %vm235_vm2, %v501_v34, inf  ;;  %v500_v36 = vsub.f32 %v496_v32, %v498_v33 }
 0x4d4   :  { %506 = vmin.xlane.f32.xlu1 %v505_v35  ;;  %v1527_v35 = vsel %vm1191_vm6, 1.0, %v1762_v6 }
 0x4d5   :  { %v502_v37 = vsel %vm235_vm2, %v500_v36, inf }
 0x4d6   :  { %503 = vmin.xlane.f32.xlu0 %v502_v37 }
 0x55d   :  { %v507_v38 = vpop.xlane.xlu1 %506 }
 0x55e   :  { %vm509_vm11 = vcmp.eq.f32.partialorder %v501_v34, %v507_v38 }
 0x55f   :  { %v511_v39 = vsel %vm509_vm11, %v1868_v31, 64  ;;  %v504_v40 = vpop.xlane.xlu0 %503 }
 0x560   :  { %v527_v41 = vsel %vm235_vm2, %v511_v39, 2147483647  ;;  %vm508_vm12 = vcmp.eq.f32.partialorder %v500_v36, %v504_v40  ;;  %v1489_v39 = vld [vmem:[%s2475_s4 + $0x50] sm:$0xff]  ;;  %v1488_v40 = vld [vmem:[%s2475_s4 + $0x48] sm:$0xff] }
 0x561   :  { %v510_v42 = vsel %vm508_vm12, %v1868_v31, 64  ;;  %v529_v43 = vshra.s32 %v527_v41, 16  ;;  %v528_v51 = vand.u32 65535, %v527_v41  ;;  %v1487_v41 = vld [vmem:[%s2475_s4 + $0x40] sm:$0xff] }
 0x562   :  { %v512_v44 = vsel %vm235_vm2, %v510_v42, 2147483647 }
 0x563   :  { %v531_v45 = vcvt.s32.f32 %v529_v43  ;;  %v514_v46 = vshra.s32 %v512_v44, 16  ;;  %v513_v52 = vand.u32 65535, %v512_v44  ;;  %v530_v54 = vcvt.s32.f32 %v528_v51 }
 0x565   :  { %532 = vmin.xlane.f32.xlu1 %v531_v45  ;;  %v516_v47 = vcvt.s32.f32 %v514_v46  ;;  %v515_v57 = vcvt.s32.f32 %v513_v52 }
 0x567   :  { %517 = vmin.xlane.f32.xlu0 %v516_v47 }
 0x5ee   :  { %v533_v53 = vpop.xlane.xlu1 %532 }
 0x5ef   :  { %vm534_vm13 = vcmp.eq.f32.partialorder %v531_v45, %v533_v53  ;;  %v539_v1 = vcvt.f32.s32 %v533_v53 }
 0x5f0   :  { %v518_v55 = vpop.xlane.xlu0 %517  ;;  %v535_v56 = vsel %vm534_vm13, %v530_v54, inf }
 0x5f1   :  { %536 = vmin.xlane.f32.xlu1 %v535_v56  ;;  %vm519_vm14 = vcmp.eq.f32.partialorder %v516_v47, %v518_v55  ;;  %v524_v2 = vcvt.f32.s32 %v518_v55  ;;  %v540_v5 = vshll.u32 %v539_v1, 16 }
 0x5f2   :  { %v520_v58 = vsel %vm519_vm14, %v515_v57, inf }
 0x5f3   :  { %521 = vmin.xlane.f32.xlu0 %v520_v58  ;;  %v525_v14 = vshll.u32 %v524_v2, 16 }
 0x67a   :  { %v537_v3 = vpop.xlane.xlu1 %536 }
 0x67b   :  { %v538_v10 = vcvt.f32.s32 %v537_v3 }
 0x67c   :  { %v522_v13 = vpop.xlane.xlu0 %521 }
 0x67d   :  { %v541_v19 = vadd.s32 %v540_v5, %v538_v10  ;;  %v523_v20 = vcvt.f32.s32 %v522_v13 }
 0x67f   :  { %vm544_vm3 = vcmp.lt.s32.totalorder %v541_v19, 63  ;;  %v526_v22 = vadd.s32 %v525_v14, %v523_v20  ;;  %v1504_v20 = vld [vmem:[%s2474_s3 + $0xb8] sm:$0xff] }
 0x680   :  { %v545_v24 = vsel %vm544_vm3, %v541_v19, 63  ;;  %1687 = vmatprep.subr.mxu0 %v1504_v20  ;;  %vm1419_vm3 = vcmp.eq.s32.totalorder %v1868_v31, 2 }
 0x681   :  { %v1994_v25 = vadd.s32 64, %v545_v24  ;;  %v1996_v26 = vsel %vm1416_vm15, %v545_v24, %v1415_v23  ;;  %vm542_vm5 = vcmp.lt.s32.totalorder %v526_v22, 63  ;;  %vm547_vm8 = vcmp.eq.s32.totalorder %v1868_v31, %v545_v24  ;;  %1688 = vmatpush3.msra.mxu0 %v1504_v20  ;;  %v1502_v23 = vld [vmem:[%s2474_s3 + $0xa8] sm:$0xff]  ;;  %v1507_v20 = vld [vmem:[%s2475_s4 + $0x60] sm:$0xff] }
 0x682   :  { %v543_v28 = vsel %vm542_vm5, %v526_v22, 63  ;;  %v1476_v36 = vsel %vm547_vm8, 1.0, %v1762_v6  ;;  %v1503_v22 = vld [vmem:[%s2474_s3 + $0xb0] sm:$0xff] }
 0x683   :  { %vm1206_vm7 = vcmp.eq.s32.totalorder %v1987_v21, %v1994_v25  ;;  %v2003_v29 = vadd.s32 64, %v543_v28  ;;  %v2005_v32 = vsel %vm1416_vm15, %v543_v28, %v1414_v27  ;;  %vm546_vm9 = vcmp.eq.s32.totalorder %v1868_v31, %v543_v28  ;;  %1689 = vmatprep.subr.mxu0 %v1503_v22 }
 0x684   :  { %v1532_v33 = vsel %vm1206_vm7, 1.0, %v1762_v6  ;;  %v1475_v4 = vsel %vm546_vm9, 1.0, %v1762_v6  ;;  %1690 = vmatpush3.msra.mxu0 %v1503_v22  ;;  %vm1205_vm15 = vcmp.eq.s32.totalorder %v1868_v31, %v1994_v25 }
 0x685   :  { %vm1204_vm10 = vcmp.eq.s32.totalorder %v1987_v21, %v2003_v29  ;;  %v2014_v34 = vadd.f32 %v1532_v33, %v1528_v8  ;;  %1673 = vmatprep.mubr.msk.f32.mxu1 %vm235_vm2, %v1475_v4  ;;  %1691 = vmatprep.subr.mxu0 %v1502_v23  ;;  %vm1203_vm0 = vcmp.eq.s32.totalorder %v1868_v31, %v2003_v29 }
 0x686   :  { %v1530_v37 = vsel %vm1204_vm10, 1.0, %v1762_v6  ;;  %1674 = vmatmul.mubr.msk.f32.vlgmr.msra.gmra.mxu1 %vm235_vm2, %v1476_v36  ;;  %1692 = vmatpush3.msra.mxu0 %v1502_v23 }
 0x687   :  { %v2021_v38 = vadd.f32 %v1530_v37, %v1527_v35  ;;  %1677 = vmatpush3.msra.mxu1 %v1490_v0  ;;  %v1501_v37 = vld [vmem:[%s2474_s3 + $0xa0] sm:$0xff] }
 0x688   :  { %1678 = vmatprep.subr.mxu1 %v1489_v39  ;;  %1693 = vmatprep.subr.mxu0 %v1501_v37 }
 0x689   :  { %1679 = vmatpush3.msra.mxu1 %v1489_v39  ;;  %1694 = vmatpush3.msra.mxu0 %v1501_v37  ;;  %v1500_v39 = vld [vmem:[%s2474_s3 + $0x98] sm:$0xff] }
 0x68a   :  { %1680 = vmatprep.subr.mxu1 %v1488_v40  ;;  %1695 = vmatprep.subr.mxu0 %v1500_v39 }
 0x68b   :  { %1681 = vmatpush3.msra.mxu1 %v1488_v40  ;;  %1696 = vmatpush3.msra.mxu0 %v1500_v39  ;;  %v1499_v40 = vld [vmem:[%s2474_s3 + $0x90] sm:$0xff] }
 0x68c   :  { %1682 = vmatprep.subr.mxu1 %v1487_v41  ;;  %1697 = vmatprep.subr.mxu0 %v1499_v40 }
 0x68d   :  { %1683 = vmatpush3.msra.mxu1 %v1487_v41  ;;  %1698 = vmatpush3.msra.mxu0 %v1499_v40  ;;  %v1498_v41 = vld [vmem:[%s2474_s3 + $0x88] sm:$0xff] }
 0x68e   :  { %1699 = vmatprep.subr.mxu0 %v1498_v41 }
 0x68f   :  { %1700 = vmatpush3.msra.mxu0 %v1498_v41 }
 0x746   :  { %v2032_v42 = vpop.f32.mrf.mxu1 }
 0x747   :  { %v2036_v43 = vsub.f32 %v1932_v16, %v2032_v42 }
 0x748   :  { %v2038_v44 = vpop.f32.mrf.mxu1 }
 0x749   :  { %v2042_v45 = vsub.f32 %v1938_v18, %v2038_v44  ;;  %v747_v46 = vmul.f32 %v2036_v43, %v2036_v43 }
 0x74b   :  { %1684 = vmatprep.mubr.msk.f32.mxu1 %vm132_vm1, %v2042_v45  ;;  %v751_v47 = vsel %vm132_vm1, %v747_v46, 0.0  ;;  %v746_v48 = vmul.f32 %v2042_v45, %v2042_v45  ;;  %v1497_v46 = vld [vmem:[%s2474_s3 + $0x80] sm:$0xff] }
 0x74c   :  { %752 = vadd.xlane.f32.xlu1 %v751_v47  ;;  %1685 = vmatmul.mubr.msk.f32.vlgmr.msra.gmra.mxu1 %vm132_vm1, %v2036_v43  ;;  %v1510_v47 = vld [vmem:[%s2475_s4 + $0x78] sm:$0xff] }
 0x74d   :  { %v748_v49 = vsel %vm132_vm1, %v746_v48, 0.0  ;;  %1701 = vmatprep.subr.mxu0 %v1497_v46  ;;  %1706 = vmatprep.subr.mxu1 %v1510_v47 }
 0x74e   :  { %749 = vadd.xlane.f32.xlu0 %v748_v49  ;;  %1702 = vmatpush3.msra.mxu0 %v1497_v46 }
 0x74f   :  { %1707 = vmatpush3.msra.mxu1 %v1510_v47 }
 0x7d5   :  { %v753_v51 = vpop.xlane.xlu1 %752 }
 0x7d6   :  { %v763_v54 = vadd.f32 %v1494_v50, %v753_v51 }
 0x7d7   :  { %v750_v52 = vpop.xlane.xlu0 %749 }
 0x7d8   :  { %v762_v57 = vadd.f32 %v1494_v50, %v750_v52 }
 0x80c   :  { %v1686_v53 = vpop.f32.mrf.mxu1 }
 0x80d   :  { %v765_v55 = vmul.f32 2.0, %v1686_v53 }
 0x80e   :  { %v737_v56 = vpop.f32.mrf.mxu1 }
 0x80f   :  { %v764_v58 = vmul.f32 2.0, %v737_v56  ;;  %v767_v59 = vsub.f32 %v763_v54, %v765_v55 }
 0x811   :  { %v771_v60 = vsel %vm235_vm2, %v767_v59, inf  ;;  %v766_v61 = vsub.f32 %v762_v57, %v764_v58  ;;  %v1529_v57 = vsel %vm1203_vm0, 1.0, %v1762_v6  ;;  %vm1422_vm0 = vcmp.eq.s32.totalorder %v1868_v31, 3 }
 0x812   :  { %772 = vmin.xlane.f32.xlu1 %v771_v60  ;;  %v1215_v25 = vadd.f32 %v1529_v57, %v1906_v7 }
 0x813   :  { %v768_v62 = vsel %vm235_vm2, %v766_v61, inf }
 0x814   :  { %769 = vmin.xlane.f32.xlu0 %v768_v62 }
 0x89b   :  { %v773_v63 = vpop.xlane.xlu1 %772 }
 0x89c   :  { %vm775_vm11 = vcmp.eq.f32.partialorder %v767_v59, %v773_v63  ;;  %v1531_v59 = vsel %vm1205_vm15, 1.0, %v1762_v6 }
 0x89d   :  { %v777_v0 = vsel %vm775_vm11, %v1868_v31, 64  ;;  %v770_v1 = vpop.xlane.xlu0 %769  ;;  %v1217_v63 = vadd.f32 %v1531_v59, %v1915_v9 }
 0x89e   :  { %v793_v2 = vsel %vm235_vm2, %v777_v0, 2147483647  ;;  %vm774_vm12 = vcmp.eq.f32.partialorder %v766_v61, %v770_v1 }
 0x89f   :  { %v776_v3 = vsel %vm774_vm12, %v1868_v31, 64  ;;  %v795_v5 = vshra.s32 %v793_v2, 16  ;;  %v794_v24 = vand.u32 65535, %v793_v2 }
 0x8a0   :  { %v778_v10 = vsel %vm235_vm2, %v776_v3, 2147483647 }
 0x8a1   :  { %v797_v13 = vcvt.s32.f32 %v795_v5  ;;  %v780_v14 = vshra.s32 %v778_v10, 16  ;;  %v779_v27 = vand.u32 65535, %v778_v10  ;;  %v796_v8 = vcvt.s32.f32 %v794_v24 }
 0x8a3   :  { %798 = vmin.xlane.f32.xlu1 %v797_v13  ;;  %v782_v19 = vcvt.s32.f32 %v780_v14  ;;  %v781_v35 = vcvt.s32.f32 %v779_v27 }
 0x8a5   :  { %783 = vmin.xlane.f32.xlu0 %v782_v19 }
 0x92c   :  { %v799_v28 = vpop.xlane.xlu1 %798 }
 0x92d   :  { %vm800_vm13 = vcmp.eq.f32.partialorder %v797_v13, %v799_v28  ;;  %v805_v48 = vcvt.f32.s32 %v799_v28 }
 0x92e   :  { %v784_v33 = vpop.xlane.xlu0 %783  ;;  %v801_v4 = vsel %vm800_vm13, %v796_v8, inf }
 0x92f   :  { %802 = vmin.xlane.f32.xlu1 %v801_v4  ;;  %vm785_vm14 = vcmp.eq.f32.partialorder %v782_v19, %v784_v33  ;;  %v790_v49 = vcvt.f32.s32 %v784_v33  ;;  %v806_v51 = vshll.u32 %v805_v48, 16  ;;  %v1508_v19 = vld [vmem:[%s2475_s4 + $0x68] sm:$0xff]  ;;  %v1514_v4 = vld [vmem:[%s2476_s5 + $0x3] ss:$0 sm:$0xff] }
 0x930   :  { %v786_v36 = vsel %vm785_vm14, %v781_v35, inf }
 0x931   :  { %787 = vmin.xlane.f32.xlu0 %v786_v36  ;;  %v791_v54 = vshll.u32 %v790_v49, 16 }
 0x9b8   :  { %v803_v50 = vpop.xlane.xlu1 %802 }
 0x9b9   :  { %v804_v52 = vcvt.f32.s32 %v803_v50 }
 0x9ba   :  { %v788_v53 = vpop.xlane.xlu0 %787 }
 0x9bb   :  { %v807_v55 = vadd.s32 %v806_v51, %v804_v52  ;;  %v789_v56 = vcvt.f32.s32 %v788_v53 }
 0x9bd   :  { %vm810_vm4 = vcmp.lt.s32.totalorder %v807_v55, 63  ;;  %v792_v58 = vadd.s32 %v791_v54, %v789_v56 }
 0x9be   :  { %v811_v60 = vsel %vm810_vm4, %v807_v55, 63 }
 0x9bf   :  { %v1220_v61 = vadd.s32 128, %v811_v60  ;;  %v2098_v62 = vsel %vm1419_vm3, %v811_v60, %v1996_v26  ;;  %vm808_vm5 = vcmp.lt.s32.totalorder %v792_v58, 63  ;;  %vm813_vm6 = vcmp.eq.s32.totalorder %v1868_v31, %v811_v60 }
 0x9c0   :  { %v809_v29 = vsel %vm808_vm5, %v792_v58, 63  ;;  %v1496_v26 = vsel %vm813_vm6, 1.0, %v1762_v6 }
 0x9c1   :  { %vm812_vm7 = vcmp.eq.s32.totalorder %v1868_v31, %v809_v29  ;;  %v1219_v0 = vadd.s32 128, %v809_v29  ;;  %v2105_v1 = vsel %vm1419_vm3, %v809_v29, %v2005_v32  ;;  %vm1224_vm8 = vcmp.eq.s32.totalorder %v1987_v21, %v1220_v61  ;;  %v1285_v29 = vld [vmem:[%s2477_s6 + $0xf0] sm:$0xff] }
 0x9c2   :  { %v1495_v2 = vsel %vm812_vm7, 1.0, %v1762_v6  ;;  %v1536_v3 = vsel %vm1224_vm8, 1.0, %v1762_v6  ;;  %vm1223_vm9 = vcmp.eq.s32.totalorder %v1868_v31, %v1220_v61  ;;  %vm1425_vm3 = vcmask 31744  }
 0x9c3   :  { %1703 = vmatprep.mubr.msk.f32.mxu0 %vm235_vm2, %v1495_v2  ;;  %vm1221_vm10 = vcmp.eq.s32.totalorder %v1868_v31, %v1219_v0  ;;  %vm1222_vm11 = vcmp.eq.s32.totalorder %v1987_v21, %v1219_v0  ;;  %v2116_v7 = vadd.f32 %v1536_v3, %v2014_v34  ;;  %v1535_v9 = vsel %vm1223_vm9, 1.0, %v1762_v6  ;;  %v1509_v34 = vld [vmem:[%s2475_s4 + $0x70] sm:$0xff]  ;;  %v1283_v0 = vld [vmem:[%s2477_s6 + $0xe0] sm:$0xff]  ;;  %v1282_v2 = vld [vmem:[%s2477_s6 + $0xd8] sm:$0xff] }
 0x9c4   :  { %v1533_v32 = vsel %vm1221_vm10, 1.0, %v1762_v6  ;;  %1704 = vmatmul.mubr.msk.f32.vlgmr.msra.gmra.mxu0 %vm235_vm2, %v1496_v26  ;;  %v1534_v5 = vsel %vm1222_vm11, 1.0, %v1762_v6  ;;  %v2122_v10 = vadd.f32 %v1535_v9, %v1217_v63  ;;  %1708 = vmatprep.subr.mxu1 %v1509_v34  ;;  %v1284_v63 = vld [vmem:[%s2477_s6 + $0xe8] sm:$0xff]  ;;  %v1281_v26 = vld [vmem:[%s2477_s6 + $0xd0] sm:$0xff]  ;;  %v1279_v9 = vld [vmem:[%s2477_s6 + $0xc0] sm:$0xff] }
 0x9c5   :  { %v2125_v13 = vadd.f32 %v1534_v5, %v2021_v38  ;;  %v2127_v14 = vadd.f32 %v1533_v32, %v1215_v25  ;;  %1709 = vmatpush3.msra.mxu1 %v1509_v34  ;;  %v1286_v25 = vld [vmem:[%s2477_s6 + $0xf8] sm:$0xff]  ;;  %v1280_v3 = vld [vmem:[%s2477_s6 + $0xc8] sm:$0xff]  ;;  %v1277_v5 = vld [vmem:[%s2477_s6 + $0xb0] sm:$0xff] }
 0x9c6   :  { %1710 = vmatprep.subr.mxu1 %v1508_v19  ;;  %1331 = vmatprep.subr.mxu0 %v1286_v25  ;;  %v1278_v32 = vld [vmem:[%s2477_s6 + $0xb8] sm:$0xff]  ;;  %v1276_v34 = vld [vmem:[%s2477_s6 + $0xa8] sm:$0xff]  ;;  %v1317_v25 = vld [vmem:[%s2477_s6 + $0x1f0] sm:$0xff] }
 0x9c7   :  { %1711 = vmatpush3.msra.mxu1 %v1508_v19  ;;  %1332 = vmatpush1.msra.mxu0 %v1285_v29  ;;  %v1275_v19 = vld [vmem:[%s2477_s6 + $0xa0] sm:$0xff]  ;;  %v1316_v29 = vld [vmem:[%s2477_s6 + $0x1e8] sm:$0xff] }
 0x9c8   :  { %1712 = vmatprep.subr.mxu1 %v1507_v20  ;;  %1333 = vmatprep.subr.mxu0 %v1284_v63  ;;  %v1315_v63 = vld [vmem:[%s2477_s6 + $0x1e0] sm:$0xff] }
 0x9c9   :  { %1713 = vmatpush3.msra.mxu1 %v1507_v20  ;;  %1334 = vmatpush1.msra.mxu0 %v1283_v0  ;;  %v1274_v20 = vld [vmem:[%s2477_s6 + $0x98] sm:$0xff] }
 0x9ca   :  { %1335 = vmatprep.subr.mxu0 %v1282_v2  ;;  %v1314_v0 = vld [vmem:[%s2477_s6 + $0x1d8] sm:$0xff]  ;;  %v1313_v2 = vld [vmem:[%s2477_s6 + $0x1d0] sm:$0xff] }
 0x9cb   :  { %1336 = vmatpush1.msra.mxu0 %v1281_v26  ;;  %v1312_v26 = vld [vmem:[%s2477_s6 + $0x1c8] sm:$0xff] }
 0x9cc   :  { %1337 = vmatprep.subr.mxu0 %v1280_v3  ;;  %v1311_v3 = vld [vmem:[%s2477_s6 + $0x1c0] sm:$0xff] }
 0x9cd   :  { %1338 = vmatpush1.msra.mxu0 %v1279_v9  ;;  %v1310_v9 = vld [vmem:[%s2477_s6 + $0x1b8] sm:$0xff] }
 0x9ce   :  { %1339 = vmatprep.subr.mxu0 %v1278_v32  ;;  %v1309_v32 = vld [vmem:[%s2477_s6 + $0x1b0] sm:$0xff] }
 0x9cf   :  { %1340 = vmatpush1.msra.mxu0 %v1277_v5  ;;  %v1308_v5 = vld [vmem:[%s2477_s6 + $0x1a8] sm:$0xff] }
 0x9d0   :  { %1341 = vmatprep.subr.mxu0 %v1276_v34  ;;  %v1307_v34 = vld [vmem:[%s2477_s6 + $0x1a0] sm:$0xff] }
 0x9d1   :  { %1342 = vmatpush1.msra.mxu0 %v1275_v19  ;;  %v1306_v19 = vld [vmem:[%s2477_s6 + $0x198] sm:$0xff] }
 0x9d2   :  { %1343 = vmatprep.subr.mxu0 %v1274_v20  ;;  %v1305_v20 = vld [vmem:[%s2477_s6 + $0x190] sm:$0xff] }
 0xa84   :  { %v2138_v38 = vpop.f32.mrf.mxu0 }
 0xa85   :  { %v2142_v22 = vsub.f32 %v2036_v43, %v2138_v38 }
 0xa86   :  { %v2144_v23 = vpop.f32.mrf.mxu0 }
 0xa87   :  { %v2148_v24 = vsub.f32 %v2042_v45, %v2144_v23  ;;  %v1013_v27 = vmul.f32 %v2142_v22, %v2142_v22 }
 0xa89   :  { %1714 = vmatprep.mubr.msk.f32.mxu1 %vm132_vm1, %v2148_v24  ;;  %v1017_v28 = vsel %vm132_vm1, %v1013_v27, 0.0  ;;  %v1012_v8 = vmul.f32 %v2148_v24, %v2148_v24  ;;  %v1273_v27 = vld [vmem:[%s2477_s6 + $0x90] sm:$0xff] }
 0xa8a   :  { %1018 = vadd.xlane.f32.xlu1 %v1017_v28  ;;  %1715 = vmatmul.mubr.msk.f32.vlgmr.msra.gmra.mxu1 %vm132_vm1, %v2142_v22  ;;  %v1272_v28 = vld [vmem:[%s2477_s6 + $0x88] sm:$0xff] }
 0xa8b   :  { %v1014_v33 = vsel %vm132_vm1, %v1012_v8, 0.0  ;;  %v1271_v8 = vld [vmem:[%s2477_s6 + $0x80] sm:$0xff]  ;;  %1344 = vmatpush1.msra.mxu0 %v1273_v27  ;;  %v1304_v27 = vld [vmem:[%s2477_s6 + $0x188] sm:$0xff] }
 0xa8c   :  { %1015 = vadd.xlane.f32.xlu0 %v1014_v33  ;;  %v1270_v33 = vld [vmem:[%s2477_s6 + $0x78] sm:$0xff]  ;;  %1345 = vmatprep.subr.mxu0 %v1272_v28  ;;  %v1303_v28 = vld [vmem:[%s2477_s6 + $0x180] sm:$0xff] }
 0xa8d   :  { %1346 = vmatpush1.msra.mxu0 %v1271_v8  ;;  %v1302_v8 = vld [vmem:[%s2477_s6 + $0x178] sm:$0xff] }
 0xa8e   :  { %1347 = vmatprep.subr.mxu0 %v1270_v33 }
 0xb13   :  { %v1019_v35 = vpop.xlane.xlu1 %1018 }
 0xb14   :  { %v1029_v39 = vadd.f32 %v1514_v4, %v1019_v35  ;;  %v1269_v35 = vld [vmem:[%s2477_s6 + $0x70] sm:$0xff] }
 0xb15   :  { %v1016_v36 = vpop.xlane.xlu0 %1015  ;;  %1348 = vmatpush1.msra.mxu0 %v1269_v35 }
 0xb16   :  { %v1028_v46 = vadd.f32 %v1514_v4, %v1016_v36  ;;  %v1524_v4 = vld [vmem:[%s2474_s3 + $0xf8] sm:$0xff]  ;;  %v1523_v36 = vld [vmem:[%s2474_s3 + $0xf0] sm:$0xff] }
 0xb17   :  { %1717 = vmatprep.subr.mxu1 %v1524_v4 }
 0xb18   :  { %1718 = vmatpush3.msra.mxu1 %v1524_v4  ;;  %v376_v4 = vsub.f32 %v1928_v15, %v1848_v11 }
 0xb19   :  { %1719 = vmatprep.subr.mxu1 %v1523_v36 }
 0xb1a   :  { %1720 = vmatpush3.msra.mxu1 %v1523_v36  ;;  %v375_v36 = vsub.f32 %v1934_v17, %v1850_v12  ;;  %v642_v12 = vsub.f32 %v2038_v44, %v1938_v18 }
 0xb1c   :  { %v377_v11 = vmul.f32 %v375_v36, %v375_v36 }
 0xb4a   :  { %v1716_v37 = vpop.f32.mrf.mxu1 }
 0xb4b   :  { %v1031_v40 = vmul.f32 2.0, %v1716_v37  ;;  %v1268_v37 = vld [vmem:[%s2477_s6 + $0x68] sm:$0xff] }
 0xb4c   :  { %v1003_v41 = vpop.f32.mrf.mxu1  ;;  %1349 = vmatprep.subr.mxu0 %v1268_v37 }
 0xb4d   :  { %v1030_v47 = vmul.f32 2.0, %v1003_v41  ;;  %v1033_v48 = vsub.f32 %v1029_v39, %v1031_v40  ;;  %v1522_v39 = vld [vmem:[%s2474_s3 + $0xe8] sm:$0xff]  ;;  %v1267_v40 = vld [vmem:[%s2477_s6 + $0x60] sm:$0xff]  ;;  %v1266_v41 = vld [vmem:[%s2477_s6 + $0x58] sm:$0xff] }
 0xb4e   :  { %1721 = vmatprep.subr.mxu1 %v1522_v39  ;;  %1350 = vmatpush1.msra.mxu0 %v1267_v40  ;;  %v378_v40 = vmul.f32 %v376_v4, %v376_v4 }
 0xb4f   :  { %v1037_v49 = vsel %vm235_vm2, %v1033_v48, inf  ;;  %v1032_v50 = vsub.f32 %v1028_v46, %v1030_v47  ;;  %v1265_v46 = vld [vmem:[%s2477_s6 + $0x50] sm:$0xff]  ;;  %v1264_v47 = vld [vmem:[%s2477_s6 + $0x48] sm:$0xff]  ;;  %1722 = vmatpush3.msra.mxu1 %v1522_v39  ;;  %1351 = vmatprep.subr.mxu0 %v1266_v41  ;;  %v643_v41 = vsub.f32 %v2032_v42, %v1932_v16  ;;  %v644_v42 = vmul.f32 %v642_v12, %v642_v12 }
 0xb50   :  { %1038 = vmin.xlane.f32.xlu1 %v1037_v49  ;;  %1352 = vmatpush1.msra.mxu0 %v1265_v46  ;;  %v1262_v49 = vld [vmem:[%s2477_s6 + $0x38] sm:$0xff]  ;;  %v382_v16 = vsel %vm132_vm1, %v378_v40, 0.0 }
 0xb51   :  { %v1034_v51 = vsel %vm235_vm2, %v1032_v50, inf  ;;  %1353 = vmatprep.subr.mxu0 %v1264_v47  ;;  %v645_v17 = vmul.f32 %v643_v41, %v643_v41  ;;  %v646_v44 = vsel %vm132_vm1, %v644_v42, 0.0  ;;  %v1322_v42 = vshrl.u32 %v126_v30, 7 }
 0xb52   :  { %1035 = vmin.xlane.f32.xlu0 %v1034_v51  ;;  %v1260_v51 = vld [vmem:[%s2477_s6 + $0x28] sm:$0xff] }
 0xbd9   :  { %v1039_v52 = vpop.xlane.xlu1 %1038 }
 0xbda   :  { %vm1041_vm12 = vcmp.eq.f32.partialorder %v1033_v48, %v1039_v52  ;;  %v1263_v48 = vld [vmem:[%s2477_s6 + $0x40] sm:$0xff] }
 0xbdb   :  { %v1043_v53 = vsel %vm1041_vm12, %v1868_v31, 64  ;;  %v1036_v54 = vpop.xlane.xlu0 %1035  ;;  %1354 = vmatpush1.msra.mxu0 %v1263_v48  ;;  %v1259_v52 = vld [vmem:[%s2477_s6 + $0x20] sm:$0xff]  ;;  %v379_v48 = vsel %vm132_vm1, %v377_v11, 0.0 }
 0xbdc   :  { %v2167_v55 = vsel %vm235_vm2, %v1043_v53, 2147483647  ;;  %vm1040_vm13 = vcmp.eq.f32.partialorder %v1032_v50, %v1036_v54  ;;  %v1261_v50 = vld [vmem:[%s2477_s6 + $0x30] sm:$0xff]  ;;  %1355 = vmatprep.subr.mxu0 %v1262_v49  ;;  %v1258_v53 = vld [vmem:[%s2477_s6 + $0x18] sm:$0xff]  ;;  %v649_v49 = vsel %vm132_vm1, %v645_v17, 0.0 }
 0xbdd   :  { %v1042_v56 = vsel %vm1040_vm13, %v1868_v31, 64  ;;  %v1061_v57 = vshra.s32 %v2167_v55, 16  ;;  %1356 = vmatpush1.msra.mxu0 %v1261_v50  ;;  %v1257_v54 = vld [vmem:[%s2477_s6 + $0x10] sm:$0xff]  ;;  %v1060_v33 = vand.u32 65535, %v2167_v55  ;;  %v1299_v50 = vld [vmem:[%s2477_s6 + $0x160] sm:$0xff] }
 0xbde   :  { %v2172_v58 = vsel %vm235_vm2, %v1042_v56, 2147483647  ;;  %1357 = vmatprep.subr.mxu0 %v1260_v51  ;;  %v1256_v56 = vld [vmem:[%s2477_s6 + $0x8] sm:$0xff]  ;;  %v1520_v51 = vld [vmem:[%s2474_s3 + $0xd8] sm:$0xff] }
 0xbdf   :  { %v2174_v59 = vcvt.s32.f32 %v1061_v57  ;;  %v1046_v60 = vshra.s32 %v2172_v58, 16  ;;  %1358 = vmatpush1.msra.mxu0 %v1259_v52  ;;  %v1255_v57 = vld [vmem:[%s2477_s6] sm:$0xff]  ;;  %v1045_v35 = vand.u32 65535, %v2172_v58  ;;  %v1062_v39 = vcvt.s32.f32 %v1060_v33  ;;  %v1298_v52 = vld [vmem:[%s2477_s6 + $0x158] sm:$0xff] }
 0xbe0   :  { %1359 = vmatprep.subr.mxu0 %v1258_v53  ;;  %v909_v58 = vsub.f32 %v2138_v38, %v2036_v43  ;;  %v1301_v43 = vld [vmem:[%s2477_s6 + $0x170] sm:$0xff]  ;;  %v1300_v38 = vld [vmem:[%s2477_s6 + $0x168] sm:$0xff] }
 0xbe1   :  { %1064 = vmin.xlane.f32.xlu1 %v2174_v59  ;;  %v2178_v61 = vcvt.s32.f32 %v1046_v60  ;;  %1360 = vmatpush1.msra.mxu0 %v1257_v54  ;;  %v1318_v60 = vld [vmem:[%s2477_s6 + $0x1f8] sm:$0xff]  ;;  %v1047_v47 = vcvt.s32.f32 %v1045_v35  ;;  %v1297_v54 = vld [vmem:[%s2477_s6 + $0x150] sm:$0xff] }
 0xbe2   :  { %1361 = vmatprep.subr.mxu0 %v1256_v56  ;;  %v1519_v56 = vld [vmem:[%s2474_s3 + $0xd0] sm:$0xff] }
 0xbe3   :  { %1049 = vmin.xlane.f32.xlu0 %v2178_v61  ;;  %1362 = vmatpush1.msra.mxu0 %v1255_v57  ;;  %v1296_v57 = vld [vmem:[%s2477_s6 + $0x148] sm:$0xff] }
 0xbe4   :  { %1363 = vmatprep.subr.mxu0 %v1318_v60  ;;  %v1295_v60 = vld [vmem:[%s2477_s6 + $0x140] sm:$0xff] }
 0xbe5   :  { %1364 = vmatpush2.msra.mxu0 %v1317_v25  ;;  %v1518_v25 = vld [vmem:[%s2474_s3 + $0xc8] sm:$0xff] }
 0xbe6   :  { %1365 = vmatprep.subr.mxu0 %v1316_v29  ;;  %v1294_v29 = vld [vmem:[%s2477_s6 + $0x138] sm:$0xff] }
 0xbe7   :  { %1366 = vmatpush2.msra.mxu0 %v1315_v63  ;;  %v1293_v63 = vld [vmem:[%s2477_s6 + $0x130] sm:$0xff] }
 0xbe8   :  { %1367 = vmatprep.subr.mxu0 %v1314_v0  ;;  %v1517_v0 = vld [vmem:[%s2474_s3 + $0xc0] sm:$0xff] }
 0xbe9   :  { %1368 = vmatpush2.msra.mxu0 %v1313_v2  ;;  %v1292_v2 = vld [vmem:[%s2477_s6 + $0x128] sm:$0xff] }
 0xbea   :  { %1369 = vmatprep.subr.mxu0 %v1312_v26  ;;  %v1291_v26 = vld [vmem:[%s2477_s6 + $0x120] sm:$0xff] }
 0xbeb   :  { %1370 = vmatpush2.msra.mxu0 %v1311_v3  ;;  %v1290_v3 = vld [vmem:[%s2477_s6 + $0x118] sm:$0xff] }
 0xbec   :  { %1371 = vmatprep.subr.mxu0 %v1310_v9  ;;  %v1289_v9 = vld [vmem:[%s2477_s6 + $0x110] sm:$0xff] }
 0xbed   :  { %1372 = vmatpush2.msra.mxu0 %v1309_v32  ;;  %v1288_v32 = vld [vmem:[%s2477_s6 + $0x108] sm:$0xff] }
 0xbee   :  { %1373 = vmatprep.subr.mxu0 %v1308_v5  ;;  %v1287_v5 = vld [vmem:[%s2477_s6 + $0x100] sm:$0xff] }
 0xbef   :  { %1374 = vmatpush2.msra.mxu0 %v1307_v34 }
 0xbf0   :  { %1375 = vmatprep.subr.mxu0 %v1306_v19 }
 0xbf1   :  { %1376 = vmatpush2.msra.mxu0 %v1305_v20 }
 0xbf2   :  { %1377 = vmatprep.subr.mxu0 %v1304_v27 }
 0xbf3   :  { %1378 = vmatpush2.msra.mxu0 %v1303_v28 }
 0xbf4   :  { %1379 = vmatprep.subr.mxu0 %v1302_v8 }
 0xbf5   :  { %1380 = vmatpush2.msra.mxu0 %v1301_v43 }
 0xbf6   :  { %1381 = vmatprep.subr.mxu0 %v1300_v38 }
 0xbf7   :  { %1382 = vmatpush2.msra.mxu0 %v1299_v50 }
 0xbf8   :  { %1383 = vmatprep.subr.mxu0 %v1298_v52 }
 0xbf9   :  { %1384 = vmatpush2.msra.mxu0 %v1297_v54 }
 0xbfa   :  { %1385 = vmatprep.subr.mxu0 %v1296_v57 }
 0xbfb   :  { %1386 = vmatpush2.msra.mxu0 %v1295_v60 }
 0xbfc   :  { %1387 = vmatprep.subr.mxu0 %v1294_v29 }
 0xbfd   :  { %1388 = vmatpush2.msra.mxu0 %v1293_v63 }
 0xbfe   :  { %1389 = vmatprep.subr.mxu0 %v1292_v2 }
 0xbff   :  { %1390 = vmatpush2.msra.mxu0 %v1291_v26 }
 0xc00   :  { %1391 = vmatprep.subr.mxu0 %v1290_v3 }
 0xc01   :  { %1392 = vmatpush2.msra.mxu0 %v1289_v9 }
 0xc02   :  { %1393 = vmatprep.subr.mxu0 %v1288_v32 }
 0xc03   :  { %1394 = vmatpush2.msra.mxu0 %v1287_v5 }
 0xc6a   :  { %v2343_v37 = vpop.xlane.xlu1 %1064 }
 0xc6b   :  { %vm1066_vm14 = vcmp.eq.f32.partialorder %v2174_v59, %v2343_v37  ;;  %v908_v59 = vsub.f32 %v2144_v23, %v2042_v45  ;;  %v1521_v45 = vld [vmem:[%s2474_s3 + $0xe0] sm:$0xff]  ;;  %v1071_v34 = vcvt.f32.s32 %v2343_v37 }
 0xc6c   :  { %v2349_v46 = vpop.xlane.xlu0 %1049  ;;  %v1067_v55 = vsel %vm1066_vm14, %v1062_v39, inf  ;;  %1723 = vmatprep.subr.mxu1 %v1521_v45 }
 0xc6d   :  { %1068 = vmin.xlane.f32.xlu1 %v1067_v55  ;;  %vm1051_vm15 = vcmp.eq.f32.partialorder %v2178_v61, %v2349_v46  ;;  %v911_v61 = vmul.f32 %v909_v58, %v909_v58  ;;  %v910_v18 = vmul.f32 %v908_v59, %v908_v59  ;;  %1724 = vmatpush3.msra.mxu1 %v1521_v45  ;;  %v1056_v19 = vcvt.f32.s32 %v2349_v46 }
 0xc6e   :  { %v1052_v15 = vsel %vm1051_vm15, %v1047_v47, inf  ;;  %1725 = vmatprep.subr.mxu1 %v1520_v51  ;;  %v1072_v27 = vshll.u32 %v1071_v34, 16  ;;  %v1323_v59 = vsub.s32 0, %v1322_v42 }
 0xc6f   :  { %1053 = vmin.xlane.f32.xlu0 %v1052_v15  ;;  %v915_v23 = vsel %vm132_vm1, %v911_v61, 0.0  ;;  %v912_v53 = vsel %vm132_vm1, %v910_v18, 0.0  ;;  %1726 = vmatpush3.msra.mxu1 %v1520_v51  ;;  %v1057_v33 = vshll.u32 %v1056_v19, 16 }
 0xc70   :  { %1727 = vmatprep.subr.mxu1 %v1519_v56 }
 0xc71   :  { %383 = vadd.xlane.f32.xlu1 %v382_v16  ;;  %1728 = vmatpush3.msra.mxu1 %v1519_v56 }
 0xc72   :  { %1729 = vmatprep.subr.mxu1 %v1518_v25 }
 0xc73   :  { %380 = vadd.xlane.f32.xlu0 %v379_v48  ;;  %1730 = vmatpush3.msra.mxu1 %v1518_v25 }
 0xc74   :  { %1731 = vmatprep.subr.mxu1 %v1517_v0 }
 0xc75   :  { %650 = vadd.xlane.f32.xlu1 %v649_v49  ;;  %1732 = vmatpush3.msra.mxu1 %v1517_v0 }
 0xc77   :  { %647 = vadd.xlane.f32.xlu0 %v646_v44 }
 0xc79   :  { %916 = vadd.xlane.f32.xlu1 %v915_v23 }
 0xc7b   :  { %913 = vadd.xlane.f32.xlu0 %v912_v53 }
 0xcf6   :  { %v1069_v20 = vpop.xlane.xlu1 %1068 }
 0xcf7   :  { %v1070_v28 = vcvt.f32.s32 %v1069_v20 }
 0xcf8   :  { %v1054_v8 = vpop.xlane.xlu0 %1053 }
 0xcf9   :  { %v1073_v4 = vadd.s32 %v1072_v27, %v1070_v28  ;;  %v1055_v35 = vcvt.f32.s32 %v1054_v8 }
 0xcfb   :  { %vm1076_vm4 = vcmp.lt.s32.totalorder %v1073_v4, 63  ;;  %v1058_v36 = vadd.s32 %v1057_v33, %v1055_v35 }
 0xcfc   :  { %v1077_v39 = vsel %vm1076_vm4, %v1073_v4, 63 }
 0xcfd   :  { %v1238_v40 = vadd.s32 192, %v1077_v39  ;;  %v1424_v41 = vsel %vm1422_vm0, %v1077_v39, %v2098_v62  ;;  %vm1074_vm5 = vcmp.lt.s32.totalorder %v1058_v36, 63  ;;  %vm1079_vm6 = vcmp.eq.s32.totalorder %v1868_v31, %v1077_v39 }
 0xcfe   :  { %1427 = vst.msk [vmem:[%s2481_s10 + $0x8] sm:$0xff] %vm1425_vm3, %v1424_v41  ;;  %v1075_v37 = vsel %vm1074_vm5, %v1058_v36, 63  ;;  %v1516_v62 = vsel %vm1079_vm6, 1.0, %v1762_v6 }
 0xcff   :  { %v1237_v46 = vadd.s32 192, %v1075_v37  ;;  %v1423_v55 = vsel %vm1422_vm0, %v1075_v37, %v2105_v1  ;;  %vm1078_vm7 = vcmp.eq.s32.totalorder %v1868_v31, %v1075_v37  ;;  %vm1242_vm8 = vcmp.eq.s32.totalorder %v1987_v21, %v1238_v40 }
 0xd00   :  { %1426 = vst.msk [vmem:[%s2481_s10] sm:$0xff] %vm1425_vm3, %v1423_v55  ;;  %v1515_v47 = vsel %vm1078_vm7, 1.0, %v1762_v6  ;;  %v1540_v12 = vsel %vm1242_vm8, 1.0, %v1762_v6  ;;  %vm1241_vm11 = vcmp.eq.s32.totalorder %v1868_v31, %v1238_v40 }
 0xd01   :  { %vm1239_vm9 = vcmp.eq.s32.totalorder %v1868_v31, %v1237_v46  ;;  %1733 = vmatprep.mubr.msk.f32.mxu1 %vm235_vm2, %v1515_v47  ;;  %vm1240_vm10 = vcmp.eq.s32.totalorder %v1987_v21, %v1237_v46  ;;  %v1254_v58 = vadd.f32 %v1540_v12, %v2116_v7  ;;  %v1539_v16 = vsel %vm1241_vm11, 1.0, %v1762_v6  ;;  %v1319_v31 = vld [vmem:[%s2478_s7] sm:$0x3]  ;;  %s1763_s7 = smov [#allocation2]  }
 0xd02   :  { %1734 = vmatmul.mubr.msk.f32.vlgmr.msra.gmra.mxu1 %vm235_vm2, %v1516_v62  ;;  %v1538_v1 = vsel %vm1240_vm10, 1.0, %v1762_v6  ;;  %v1537_v11 = vsel %vm1239_vm9, 1.0, %v1762_v6  ;;  %v1253_v21 = vadd.f32 %v1539_v16, %v2122_v10  ;;  %v1324_v61 = vrot.slane %v1319_v31, %v1323_v59  ;;  %s1438_s16 = sshll.u32 %s1763_s7, 4  ;;  %s1439_s16 = int_to_ptr.vmem [resolvable:$true] %s1438_s16 }
 0xd03   :  { %v1252_v15 = vadd.f32 %v1538_v1, %v2125_v13  ;;  %v1251_v17 = vadd.f32 %v1537_v11, %v2127_v14  ;;  %v1327_v13 = vsub.s32 1, %v1322_v42  ;;  %vm1409_vm2 = vcmask 392192   ;;  %s1740_s4 = scalar_lea.vmem %s1439_s16, 512  ;;  %p1745_p1 = scmp.lt.s32.totalorder %s1439_s16, %s1439_s16 }
 0xd04   :  { %p1741_p0 = scmp.ne.s32.totalorder %s1439_s16, %s1740_s4  ;;  %p1746_p2 = scmp.lt.s32.totalorder %s1740_s4, %s1740_s4 }
 0xd05   :  { %1395 = vmatprep.mubr.f32.mxu0 %v1252_v15  ;;  %v1328_v18 = vrot.slane %v1319_v31, %v1327_v13 }
 0xd06   :  { %1396 = vmatmul.mubr.f32.vlgmr.msra.gmra.mxu0 %v1251_v17  ;;  %p1747_p3 = por %p1746_p2, %p1745_p1 }
 0xd07   :  { %1401 = vmatprep.mubr.f32.mxu0 %v1254_v58 }
 0xd08   :  { %p1748_p4 = pnand %p1747_p3, %p1741_p0 }
 0xd0a   :  { %1402 = vmatmul.mubr.f32.gmra.mxu0 %v1253_v21 }
 0xdc2   :  { %v1735_v48 = vpop.f32.mrf.mxu1 }
 0xdc3   :  { %v1175_v14 = vsub.f32 %v1735_v48, %v2142_v22 }
 0xdc4   :  { %v1165_v7 = vpop.f32.mrf.mxu1 }
 0xdc5   :  { %v1177_v49 = vmul.f32 %v1175_v14, %v1175_v14  ;;  %v1174_v6 = vsub.f32 %v1165_v7, %v2148_v24 }
 0xdc6   :  { %v1397_v44 = vpop.f32.mrf.mxu0 }
 0xdc7   :  { %v1176_v10 = vmul.f32 %v1174_v6, %v1174_v6  ;;  %v1398_v43 = vadd.f32 %v1397_v44, %v1324_v61  ;;  %v1181_v30 = vsel %vm132_vm1, %v1177_v49, 0.0 }
 0xdc8   :  { %v1399_v45 = vpop.f32.mrf.mxu0  ;;  %1182 = vadd.xlane.f32.xlu1 %v1181_v30 }
 0xdc9   :  { %1408 = vst [vmem:[#allocation2] sm:$0xff] %v1398_v43  ;;  %v1400_v38 = vadd.f32 %v1399_v45, %v1328_v18  ;;  %v1178_v23 = vsel %vm132_vm1, %v1176_v10, 0.0 }
 0xdca   :  { %v1403_v50 = vpop.f32.mrf.mxu0  ;;  %1179 = vadd.xlane.f32.xlu0 %v1178_v23 }
 0xdcb   :  { %1410 = vst.msk [vmem:[#allocation2 + $0x8] sm:$0xff] %vm1409_vm2, %v1400_v38  ;;  %v1404_v22 = vadd.f32 %v1403_v50, %v1324_v61 }
 0xdcc   :  { %v1405_v51 = vpop.f32.mrf.mxu0 }
 0xdcd   :  { %1411 = vst [vmem:[#allocation2 + $0x10] sm:$0xff] %v1404_v22  ;;  %v1406_v24 = vadd.f32 %v1405_v51, %v1328_v18 }
 0xdcf   :  { %1412 = vst.msk [vmem:[#allocation2 + $0x18] sm:$0xff] %vm1409_vm2, %v1406_v24 }
 0xdd0   :  { %1751 = shalt.err (!%p1748_p4)
}
 0xdd1   :  { %s1764_s17 = smov 256   ;;  %s1765_s5 = smov 16   ;;  %v384_v52 = vpop.xlane.xlu1 %383  ;;  %v381_v53 = vpop.xlane.xlu0 %380  ;;  %vm1430_vm1 = vcmask 7168  }
 0xdd2   :  { %1444 = dma.vmem_to_hbm [thread:$0]  %s1439_s16, 512, %s2479_s8, [#allocation3], %s1764_s17, %s1764_s17, %s1765_s5   ;;  %v387_v29 = vmul.f32 0.03125, %v384_v52  ;;  %v386_v2 = vmul.f32 0.03125, %v381_v53 }
 0xdd4   :  { %v389_v9 = vmul.f32 1.25, %v387_v29  ;;  %v388_v19 = vmul.f32 1.25, %v386_v2 }
 0xdd5   :  { %v651_v54 = vpop.xlane.xlu1 %650  ;;  %v648_v56 = vpop.xlane.xlu0 %647 }
 0xdd6   :  { %v653_v60 = vmul.f32 0.03125, %v651_v54  ;;  %v652_v63 = vmul.f32 0.03125, %v648_v56 }
 0xdd8   :  { %v655_v26 = vmul.f32 1.25, %v653_v60  ;;  %v654_v32 = vmul.f32 1.25, %v652_v63 }
 0xdd9   :  { %v917_v57 = vpop.xlane.xlu1 %916  ;;  %v914_v25 = vpop.xlane.xlu0 %913 }
 0xdda   :  { %v919_v0 = vmul.f32 0.03125, %v917_v57  ;;  %v918_v3 = vmul.f32 0.03125, %v914_v25  ;;  %v657_v20 = vadd.f32 %v655_v26, %v389_v9  ;;  %v656_v33 = vadd.f32 %v654_v32, %v388_v19 }
 0xddc   :  { %v921_v5 = vmul.f32 1.25, %v919_v0  ;;  %v920_v27 = vmul.f32 1.25, %v918_v3 }
 0xdde   :  { %v923_v4 = vadd.f32 %v921_v5, %v657_v20  ;;  %v922_v39 = vadd.f32 %v920_v27, %v656_v33 }
 0xe51   :  { %v1183_v34 = vpop.xlane.xlu1 %1182 }
 0xe52   :  { %v1185_v28 = vmul.f32 0.03125, %v1183_v34 }
 0xe53   :  { %v1180_v8 = vpop.xlane.xlu0 %1179 }
 0xe54   :  { %v1187_v35 = vmul.f32 1.25, %v1185_v28  ;;  %v1184_v36 = vmul.f32 0.03125, %v1180_v8 }
 0xe56   :  { %v1189_v40 = vadd.f32 %v1187_v35, %v923_v4  ;;  %v1186_v41 = vmul.f32 1.25, %v1184_v36 }
 0xe58   :  { %v1429_v37 = vmul.f32 0.25, %v1189_v40  ;;  %v1188_v46 = vadd.f32 %v1186_v41, %v922_v39 }
 0xe5a   :  { %1432 = vst.msk [vmem:[%s2480_s9 + $0x8] sm:$0xff] %vm1430_vm1, %v1429_v37  ;;  %v1428_v55 = vmul.f32 0.25, %v1188_v46 }
 0xe5c   :  { %1431 = vst.msk [vmem:[%s2480_s9] sm:$0xff] %vm1430_vm1, %v1428_v55 }
 0xe5d   :  { %1760 = dma.done.wait [#allocation3], 512  }
 0xe5e   :  { %1761 = vsyncadd [#allocation3], 4294966784 }
 0xe5f   :  { %1456 = vsyncpa [#allocation3], 1 }

</bundles_post_ra>
